<compile_context>
chip_gen: v7x
topology: tpu7x:2x2x1
jax: 0.10.0
libtpu: 0.0.40
codegen_flags: <defaults>
</compile_context>

<pallas_src>
import functools

import jax
import jax.numpy as jnp
from jax import lax
from jax.experimental import pallas as pl
from jax.experimental.pallas import tpu as pltpu

_LANES = 128


def _subsample_kernel(rand_ref, wav_ref, o1_ref, o2_ref, *, k):
    # rand_ref: (1, br, 128) int8   -- random offsets r_i in [0, k)
    # wav_ref : (C, br, k*128) f32  -- raw samples; lane q = p*k + j of row
    #                                  `row` holds wav[c, (row0+row)*128*k + q],
    #                                  i.e. candidate j of output lane p.
    # o1_ref, o2_ref: (C, br, 128)
    C, br, kL = wav_ref.shape
    log2k = 1 if k == 2 else 2

    # Constant 0/1 matrices (exact in bf16), rebuilt per grid step on the VPU:
    #   sum_mat[q, p] = 1 iff q // k == p : contracts k*128 interleaved lanes
    #                                       down to the 128 output lanes.
    #   exp_mat[p, q] = 1 iff q // k == p : expands 128 offset lanes to k*128.
    qa = lax.broadcasted_iota(jnp.int32, (kL, _LANES), 0)
    pa = lax.broadcasted_iota(jnp.int32, (kL, _LANES), 1)
    sum_mat = ((qa >> log2k) == pa).astype(jnp.bfloat16)          # (k*128, 128)
    pe = lax.broadcasted_iota(jnp.int32, (_LANES, kL), 0)
    qe = lax.broadcasted_iota(jnp.int32, (_LANES, kL), 1)
    exp_mat = ((qe >> log2k) == pe).astype(jnp.bfloat16)          # (128, k*128)

    # Expand offsets to the interleaved lane domain with one small exact
    # matmul (values 0..k-1 are exact in bf16; exp_mat is one-hot per column).
    r = rand_ref[0].astype(jnp.int32).astype(jnp.bfloat16)        # (br, 128)
    r_exp = jnp.dot(r, exp_mat, preferred_element_type=jnp.float32)
    r_exp = r_exp.astype(jnp.int32)                               # (br, k*128)

    j_lane = lax.broadcasted_iota(jnp.int32, (br, kL), 1) & (k - 1)   # q % k
    m1 = r_exp == j_lane                                  # picks offset r
    m2 = r_exp == ((j_lane + (k - 1)) & (k - 1))          # picks offset (r+1)%k

    for c in range(C):                                    # C is small & static
        w = wav_ref[c]                                    # (br, k*128) f32
        for mask, o_ref in ((m1, o1_ref), (m2, o2_ref)):
            x = jnp.where(mask, w, 0.0)
            # Exact 3-way bf16 split: x == hi + mid + lo bit-exactly for
            # normal f32 values, and (hi + mid) + lo re-sums exactly in f32,
            # so the bf16 MXU contractions below are an exact gather.
            hi = x.astype(jnp.bfloat16)
            hi_f = hi.astype(jnp.float32)
            mid = (x - hi_f).astype(jnp.bfloat16)
            lo = (x - hi_f - mid.astype(jnp.float32)).astype(jnp.bfloat16)
            acc = jnp.dot(hi, sum_mat, preferred_element_type=jnp.float32)
            acc = acc + jnp.dot(mid, sum_mat, preferred_element_type=jnp.float32)
            acc = acc + jnp.dot(lo, sum_mat, preferred_element_type=jnp.float32)
            o_ref[c] = acc.astype(o_ref.dtype)


def subsample_pallas(wav, rand_nums, k, *, block_rows=None):
    assert k in (2, 4), "value of k can only be 2 or 4"
    assert wav.dtype == jnp.float32, "exact bf16-split path assumes float32"
    # TODO(synk): for bf16 inputs the 3-way split collapses to a single exact
    # bf16 matmul; not wired up since the module operates on FloatTensor.
    k_correction = 192 if k == 4 else 128
    C, L = wav.shape
    S = L // k - k_correction
    assert S > 0, "input too short for this k"
    kL = k * _LANES

    nr = pl.cdiv(S, _LANES)                  # rows of 128 output positions
    # Default block rows keep double-buffered blocks + in-kernel temporaries
    # around 8-12 MB: big enough to sit near the HBM roofline, small enough
    # for every generation's scoped VMEM (32 MiB requested below).
    target = block_rows if block_rows else (512 if k == 2 else 384)
    target = max(32, target - target % 32)   # sublane-packing multiple
    steps = pl.cdiv(nr, target)
    if nr >= 64:
        steps = max(steps, 2)                # give both v7x TensorCores work
    if steps > 1 and steps % 2:
        steps += 1                           # even split across the 2 TCs
    br = max(32, pl.cdiv(pl.cdiv(nr, steps), 32) * 32)   # balanced block rows
    nr_pad = steps * br
    s_pad = nr_pad * _LANES
    need = s_pad * k                         # raw samples the grid covers

    if need > L:
        wav_src = jnp.pad(wav, ((0, 0), (0, need - L)))
    elif need < L:
        wav_src = wav[:, :need]
    else:
        wav_src = wav
    wav3 = wav_src.reshape(C, nr_pad, kL)    # free reshape -- no transpose pass

    r8 = jnp.pad(rand_nums.astype(jnp.int8), (0, s_pad - S))
    r8 = r8.reshape(1, nr_pad, _LANES)

    kernel = functools.partial(_subsample_kernel, k=k)
    out1, out2 = pl.pallas_call(
        kernel,
        out_shape=(
            jax.ShapeDtypeStruct((C, nr_pad, _LANES), wav.dtype),
            jax.ShapeDtypeStruct((C, nr_pad, _LANES), wav.dtype),
        ),
        grid_spec=pltpu.PrefetchScalarGridSpec(
            num_scalar_prefetch=0,
            grid=(steps,),
            in_specs=[
                pl.BlockSpec((1, br, _LANES), lambda i: (0, i, 0)),  # offsets
                pl.BlockSpec((C, br, kL), lambda i: (0, i, 0)),      # raw wav
            ],
            out_specs=[
                pl.BlockSpec((C, br, _LANES), lambda i: (0, i, 0)),
                pl.BlockSpec((C, br, _LANES), lambda i: (0, i, 0)),
            ],
        ),
        compiler_params=pltpu.CompilerParams(
            dimension_semantics=("parallel",),
            vmem_limit_bytes=32 * 1024 * 1024),
    )(r8, wav3)

    # Free reshape; the [:, :S] trim is left for XLA to fuse into the consumer.
    wav1 = out1.reshape(C, s_pad)[:, :S]
    wav2 = out2.reshape(C, s_pad)[:, :S]
    return wav1, wav2


if __name__ == "__main__":
    key = jax.random.PRNGKey(0)
    C = 2
    # Small single-block cases plus moderate multi-block cases for both k.
    cases = ((2, 512), (4, 1024), (2, 16640), (4, 197376))
    for k, L in cases:
        key, kw, kr = jax.random.split(key, 3)
        k_correction = 192 if k == 4 else 128
        S = L // k - k_correction

        wav = jax.random.normal(kw, (C, L), dtype=jnp.float32)
        rand_nums = jax.random.randint(kr, (S,), 0, k, dtype=jnp.int32)

        wav1, wav2 = subsample_pallas(wav, rand_nums, k)
        jax.block_until_ready((wav1, wav2))

        # Pure-JAX reference of the PyTorch gather semantics.
        idx = jnp.arange(S) * k
        wav1_ref = wav[:, idx + rand_nums]
        wav2_ref = wav[:, idx + (rand_nums + 1) % k]

        assert wav1.shape == (C, S) and wav2.shape == (C, S)
        assert wav1.dtype == wav.dtype and wav2.dtype == wav.dtype
        assert jnp.array_equal(wav1, wav1_ref), f"wav1 mismatch (k={k}, L={L})"
        assert jnp.array_equal(wav2, wav2_ref), f"wav2 mismatch (k={k}, L={L})"

    print("KERNEL_OK")
</pallas_src>

<mosaic_0001>
module attributes {stable_mosaic.version = 11 : i64} {
  func.func @_subsample_kernel(%arg0: i32, %arg1: memref<1x32x128xi8, #tpu.memory_space<vmem>>, %arg2: memref<2x32x256xf32, #tpu.memory_space<vmem>>, %arg3: memref<2x32x128xf32, #tpu.memory_space<vmem>>, %arg4: memref<2x32x128xf32, #tpu.memory_space<vmem>>) attributes {dimension_semantics = [#tpu.dimension_semantics<parallel>], iteration_bounds = array<i64: 1>, scalar_prefetch = 0 : i64, scratch_operands = 0 : i64, tpu.core_type = #tpu.core_type<tc>, window_params = [{transform_indices = @transform_0, window_bounds = array<i64: 1, 32, 128>}, {transform_indices = @transform_1, window_bounds = array<i64: 2, 32, 256>}, {transform_indices = @transform_2, window_bounds = array<i64: 2, 32, 128>}, {transform_indices = @transform_3, window_bounds = array<i64: 2, 32, 128>}]} {
    %0 = tpu.iota {dimensions = array<i32: 0>} : vector<256x128xi32>
    %1 = tpu.iota {dimensions = array<i32: 1>} : vector<256x128xi32>
    %c1_i32 = arith.constant 1 : i32
    %2 = vector.broadcast %c1_i32 : i32 to vector<256x128xi32>
    %3 = arith.shrsi %0, %2 : vector<256x128xi32>
    %4 = arith.cmpi eq, %3, %1 : vector<256x128xi32>
    %5 = arith.extui %4 : vector<256x128xi1> to vector<256x128xi32>
    %6 = arith.sitofp %5 : vector<256x128xi32> to vector<256x128xf32>
    %7 = arith.truncf %6 : vector<256x128xf32> to vector<256x128xbf16>
    %8 = tpu.iota {dimensions = array<i32: 0>} : vector<128x256xi32>
    %9 = tpu.iota {dimensions = array<i32: 1>} : vector<128x256xi32>
    %c1_i32_0 = arith.constant 1 : i32
    %10 = vector.broadcast %c1_i32_0 : i32 to vector<128x256xi32>
    %11 = arith.shrsi %9, %10 : vector<128x256xi32>
    %12 = arith.cmpi eq, %11, %8 : vector<128x256xi32>
    %13 = arith.extui %12 : vector<128x256xi1> to vector<128x256xi32>
    %14 = arith.sitofp %13 : vector<128x256xi32> to vector<128x256xf32>
    %15 = arith.truncf %14 : vector<128x256xf32> to vector<128x256xbf16>
    %c0 = arith.constant 0 : index
    %c0_1 = arith.constant 0 : index
    %c0_2 = arith.constant 0 : index
    %16 = vector.load %arg1[%c0, %c0_1, %c0_2] : memref<1x32x128xi8, #tpu.memory_space<vmem>>, vector<1x32x128xi8>
    %17 = vector.shape_cast %16 : vector<1x32x128xi8> to vector<32x128xi8>
    %18 = arith.extsi %17 : vector<32x128xi8> to vector<32x128xi32>
    %19 = arith.sitofp %18 : vector<32x128xi32> to vector<32x128xbf16>
    %cst = arith.constant dense<0.000000e+00> : vector<32x256xf32>
    %20 = tpu.matmul %19, %15, %cst {dimension_numbers = #tpu.dot_dimension_numbers<[1], [0], [0], [1], [0, 0, 1, 1], [], []>} : vector<32x128xbf16>, vector<128x256xbf16>, vector<32x256xf32> -> vector<32x256xf32>
    %21 = arith.fptosi %20 : vector<32x256xf32> to vector<32x256xi32>
    %22 = tpu.iota {dimensions = array<i32: 1>} : vector<32x256xi32>
    %c1_i32_3 = arith.constant 1 : i32
    %23 = vector.broadcast %c1_i32_3 : i32 to vector<32x256xi32>
    %24 = arith.andi %22, %23 : vector<32x256xi32>
    %25 = arith.cmpi eq, %21, %24 : vector<32x256xi32>
    %c1_i32_4 = arith.constant 1 : i32
    %26 = vector.broadcast %c1_i32_4 : i32 to vector<32x256xi32>
    %27 = arith.addi %24, %26 : vector<32x256xi32>
    %c1_i32_5 = arith.constant 1 : i32
    %28 = vector.broadcast %c1_i32_5 : i32 to vector<32x256xi32>
    %29 = arith.andi %27, %28 : vector<32x256xi32>
    %30 = arith.cmpi eq, %21, %29 : vector<32x256xi32>
    %c0_6 = arith.constant 0 : index
    %c0_7 = arith.constant 0 : index
    %c0_8 = arith.constant 0 : index
    %31 = vector.load %arg2[%c0_6, %c0_7, %c0_8] : memref<2x32x256xf32, #tpu.memory_space<vmem>>, vector<1x32x256xf32>
    %32 = vector.shape_cast %31 : vector<1x32x256xf32> to vector<32x256xf32>
    %cst_9 = arith.constant 0.000000e+00 : f32
    %33 = vector.broadcast %cst_9 : f32 to vector<32x256xf32>
    %34 = arith.select %25, %32, %33 : vector<32x256xi1>, vector<32x256xf32>
    %35 = arith.truncf %34 : vector<32x256xf32> to vector<32x256xbf16>
    %36 = arith.extf %35 : vector<32x256xbf16> to vector<32x256xf32>
    %37 = arith.subf %34, %36 : vector<32x256xf32>
    %38 = arith.truncf %37 : vector<32x256xf32> to vector<32x256xbf16>
    %39 = arith.subf %34, %36 : vector<32x256xf32>
    %40 = arith.extf %38 : vector<32x256xbf16> to vector<32x256xf32>
    %41 = arith.subf %39, %40 : vector<32x256xf32>
    %42 = arith.truncf %41 : vector<32x256xf32> to vector<32x256xbf16>
    %cst_10 = arith.constant dense<0.000000e+00> : vector<32x128xf32>
    %43 = tpu.matmul %35, %7, %cst_10 {dimension_numbers = #tpu.dot_dimension_numbers<[1], [0], [0], [1], [0, 0, 1, 1], [], []>} : vector<32x256xbf16>, vector<256x128xbf16>, vector<32x128xf32> -> vector<32x128xf32>
    %cst_11 = arith.constant dense<0.000000e+00> : vector<32x128xf32>
    %44 = tpu.matmul %38, %7, %cst_11 {dimension_numbers = #tpu.dot_dimension_numbers<[1], [0], [0], [1], [0, 0, 1, 1], [], []>} : vector<32x256xbf16>, vector<256x128xbf16>, vector<32x128xf32> -> vector<32x128xf32>
    %45 = arith.addf %43, %44 : vector<32x128xf32>
    %cst_12 = arith.constant dense<0.000000e+00> : vector<32x128xf32>
    %46 = tpu.matmul %42, %7, %cst_12 {dimension_numbers = #tpu.dot_dimension_numbers<[1], [0], [0], [1], [0, 0, 1, 1], [], []>} : vector<32x256xbf16>, vector<256x128xbf16>, vector<32x128xf32> -> vector<32x128xf32>
    %47 = arith.addf %45, %46 : vector<32x128xf32>
    %c0_13 = arith.constant 0 : index
    %c0_14 = arith.constant 0 : index
    %c0_15 = arith.constant 0 : index
    %48 = vector.load %arg3[%c0_13, %c0_14, %c0_15] : memref<2x32x128xf32, #tpu.memory_space<vmem>>, vector<1x32x128xf32>
    %49 = vector.shape_cast %48 : vector<1x32x128xf32> to vector<32x128xf32>
    %50 = vector.shape_cast %47 : vector<32x128xf32> to vector<1x32x128xf32>
    tpu.vector_store %arg3[%c0_13, %c0_14, %c0_15], %50 {strides = array<i32>} : memref<2x32x128xf32, #tpu.memory_space<vmem>>, vector<1x32x128xf32>,
    %cst_16 = arith.constant 0.000000e+00 : f32
    %51 = vector.broadcast %cst_16 : f32 to vector<32x256xf32>
    %52 = arith.select %30, %32, %51 : vector<32x256xi1>, vector<32x256xf32>
    %53 = arith.truncf %52 : vector<32x256xf32> to vector<32x256xbf16>
    %54 = arith.extf %53 : vector<32x256xbf16> to vector<32x256xf32>
    %55 = arith.subf %52, %54 : vector<32x256xf32>
    %56 = arith.truncf %55 : vector<32x256xf32> to vector<32x256xbf16>
    %57 = arith.subf %52, %54 : vector<32x256xf32>
    %58 = arith.extf %56 : vector<32x256xbf16> to vector<32x256xf32>
    %59 = arith.subf %57, %58 : vector<32x256xf32>
    %60 = arith.truncf %59 : vector<32x256xf32> to vector<32x256xbf16>
    %cst_17 = arith.constant dense<0.000000e+00> : vector<32x128xf32>
    %61 = tpu.matmul %53, %7, %cst_17 {dimension_numbers = #tpu.dot_dimension_numbers<[1], [0], [0], [1], [0, 0, 1, 1], [], []>} : vector<32x256xbf16>, vector<256x128xbf16>, vector<32x128xf32> -> vector<32x128xf32>
    %cst_18 = arith.constant dense<0.000000e+00> : vector<32x128xf32>
    %62 = tpu.matmul %56, %7, %cst_18 {dimension_numbers = #tpu.dot_dimension_numbers<[1], [0], [0], [1], [0, 0, 1, 1], [], []>} : vector<32x256xbf16>, vector<256x128xbf16>, vector<32x128xf32> -> vector<32x128xf32>
    %63 = arith.addf %61, %62 : vector<32x128xf32>
    %cst_19 = arith.constant dense<0.000000e+00> : vector<32x128xf32>
    %64 = tpu.matmul %60, %7, %cst_19 {dimension_numbers = #tpu.dot_dimension_numbers<[1], [0], [0], [1], [0, 0, 1, 1], [], []>} : vector<32x256xbf16>, vector<256x128xbf16>, vector<32x128xf32> -> vector<32x128xf32>
    %65 = arith.addf %63, %64 : vector<32x128xf32>
    %c0_20 = arith.constant 0 : index
    %c0_21 = arith.constant 0 : index
    %c0_22 = arith.constant 0 : index
    %66 = vector.load %arg4[%c0_20, %c0_21, %c0_22] : memref<2x32x128xf32, #tpu.memory_space<vmem>>, vector<1x32x128xf32>
    %67 = vector.shape_cast %66 : vector<1x32x128xf32> to vector<32x128xf32>
    %68 = vector.shape_cast %65 : vector<32x128xf32> to vector<1x32x128xf32>
    tpu.vector_store %arg4[%c0_20, %c0_21, %c0_22], %68 {strides = array<i32>} : memref<2x32x128xf32, #tpu.memory_space<vmem>>, vector<1x32x128xf32>,
    %c1 = arith.constant 1 : index
    %c0_23 = arith.constant 0 : index
    %c0_24 = arith.constant 0 : index
    %69 = vector.load %arg2[%c1, %c0_23, %c0_24] : memref<2x32x256xf32, #tpu.memory_space<vmem>>, vector<1x32x256xf32>
    %70 = vector.shape_cast %69 : vector<1x32x256xf32> to vector<32x256xf32>
    %cst_25 = arith.constant 0.000000e+00 : f32
    %71 = vector.broadcast %cst_25 : f32 to vector<32x256xf32>
    %72 = arith.select %25, %70, %71 : vector<32x256xi1>, vector<32x256xf32>
    %73 = arith.truncf %72 : vector<32x256xf32> to vector<32x256xbf16>
    %74 = arith.extf %73 : vector<32x256xbf16> to vector<32x256xf32>
    %75 = arith.subf %72, %74 : vector<32x256xf32>
    %76 = arith.truncf %75 : vector<32x256xf32> to vector<32x256xbf16>
    %77 = arith.subf %72, %74 : vector<32x256xf32>
    %78 = arith.extf %76 : vector<32x256xbf16> to vector<32x256xf32>
    %79 = arith.subf %77, %78 : vector<32x256xf32>
    %80 = arith.truncf %79 : vector<32x256xf32> to vector<32x256xbf16>
    %cst_26 = arith.constant dense<0.000000e+00> : vector<32x128xf32>
    %81 = tpu.matmul %73, %7, %cst_26 {dimension_numbers = #tpu.dot_dimension_numbers<[1], [0], [0], [1], [0, 0, 1, 1], [], []>} : vector<32x256xbf16>, vector<256x128xbf16>, vector<32x128xf32> -> vector<32x128xf32>
    %cst_27 = arith.constant dense<0.000000e+00> : vector<32x128xf32>
    %82 = tpu.matmul %76, %7, %cst_27 {dimension_numbers = #tpu.dot_dimension_numbers<[1], [0], [0], [1], [0, 0, 1, 1], [], []>} : vector<32x256xbf16>, vector<256x128xbf16>, vector<32x128xf32> -> vector<32x128xf32>
    %83 = arith.addf %81, %82 : vector<32x128xf32>
    %cst_28 = arith.constant dense<0.000000e+00> : vector<32x128xf32>
    %84 = tpu.matmul %80, %7, %cst_28 {dimension_numbers = #tpu.dot_dimension_numbers<[1], [0], [0], [1], [0, 0, 1, 1], [], []>} : vector<32x256xbf16>, vector<256x128xbf16>, vector<32x128xf32> -> vector<32x128xf32>
    %85 = arith.addf %83, %84 : vector<32x128xf32>
    %c1_29 = arith.constant 1 : index
    %c0_30 = arith.constant 0 : index
    %c0_31 = arith.constant 0 : index
    %86 = vector.load %arg3[%c1_29, %c0_30, %c0_31] : memref<2x32x128xf32, #tpu.memory_space<vmem>>, vector<1x32x128xf32>
    %87 = vector.shape_cast %86 : vector<1x32x128xf32> to vector<32x128xf32>
    %88 = vector.shape_cast %85 : vector<32x128xf32> to vector<1x32x128xf32>
    tpu.vector_store %arg3[%c1_29, %c0_30, %c0_31], %88 {strides = array<i32>} : memref<2x32x128xf32, #tpu.memory_space<vmem>>, vector<1x32x128xf32>,
    %cst_32 = arith.constant 0.000000e+00 : f32
    %89 = vector.broadcast %cst_32 : f32 to vector<32x256xf32>
    %90 = arith.select %30, %70, %89 : vector<32x256xi1>, vector<32x256xf32>
    %91 = arith.truncf %90 : vector<32x256xf32> to vector<32x256xbf16>
    %92 = arith.extf %91 : vector<32x256xbf16> to vector<32x256xf32>
    %93 = arith.subf %90, %92 : vector<32x256xf32>
    %94 = arith.truncf %93 : vector<32x256xf32> to vector<32x256xbf16>
    %95 = arith.subf %90, %92 : vector<32x256xf32>
    %96 = arith.extf %94 : vector<32x256xbf16> to vector<32x256xf32>
    %97 = arith.subf %95, %96 : vector<32x256xf32>
    %98 = arith.truncf %97 : vector<32x256xf32> to vector<32x256xbf16>
    %cst_33 = arith.constant dense<0.000000e+00> : vector<32x128xf32>
    %99 = tpu.matmul %91, %7, %cst_33 {dimension_numbers = #tpu.dot_dimension_numbers<[1], [0], [0], [1], [0, 0, 1, 1], [], []>} : vector<32x256xbf16>, vector<256x128xbf16>, vector<32x128xf32> -> vector<32x128xf32>
    %cst_34 = arith.constant dense<0.000000e+00> : vector<32x128xf32>
    %100 = tpu.matmul %94, %7, %cst_34 {dimension_numbers = #tpu.dot_dimension_numbers<[1], [0], [0], [1], [0, 0, 1, 1], [], []>} : vector<32x256xbf16>, vector<256x128xbf16>, vector<32x128xf32> -> vector<32x128xf32>
    %101 = arith.addf %99, %100 : vector<32x128xf32>
    %cst_35 = arith.constant dense<0.000000e+00> : vector<32x128xf32>
    %102 = tpu.matmul %98, %7, %cst_35 {dimension_numbers = #tpu.dot_dimension_numbers<[1], [0], [0], [1], [0, 0, 1, 1], [], []>} : vector<32x256xbf16>, vector<256x128xbf16>, vector<32x128xf32> -> vector<32x128xf32>
    %103 = arith.addf %101, %102 : vector<32x128xf32>
    %c1_36 = arith.constant 1 : index
    %c0_37 = arith.constant 0 : index
    %c0_38 = arith.constant 0 : index
    %104 = vector.load %arg4[%c1_36, %c0_37, %c0_38] : memref<2x32x128xf32, #tpu.memory_space<vmem>>, vector<1x32x128xf32>
    %105 = vector.shape_cast %104 : vector<1x32x128xf32> to vector<32x128xf32>
    %106 = vector.shape_cast %103 : vector<32x128xf32> to vector<1x32x128xf32>
    tpu.vector_store %arg4[%c1_36, %c0_37, %c0_38], %106 {strides = array<i32>} : memref<2x32x128xf32, #tpu.memory_space<vmem>>, vector<1x32x128xf32>,
    return
  }
  func.func @transform_0(%arg0: i32) -> (i32, i32, i32) {
    %c0_i32 = arith.constant 0 : i32
    %c0_i32_0 = arith.constant 0 : i32
    %c0_i32_1 = arith.constant 0 : i32
    return %c0_i32, %arg0, %c0_i32_0 : i32, i32, i32
  }
  func.func @transform_1(%arg0: i32) -> (i32, i32, i32) {
    %c0_i32 = arith.constant 0 : i32
    %c0_i32_0 = arith.constant 0 : i32
    %c0_i32_1 = arith.constant 0 : i32
    return %c0_i32, %arg0, %c0_i32_0 : i32, i32, i32
  }
  func.func @transform_2(%arg0: i32) -> (i32, i32, i32) {
    %c0_i32 = arith.constant 0 : i32
    %c0_i32_0 = arith.constant 0 : i32
    %c0_i32_1 = arith.constant 0 : i32
    return %c0_i32, %arg0, %c0_i32_0 : i32, i32, i32
  }
  func.func @transform_3(%arg0: i32) -> (i32, i32, i32) {
    %c0_i32 = arith.constant 0 : i32
    %c0_i32_0 = arith.constant 0 : i32
    %c0_i32_1 = arith.constant 0 : i32
    return %c0_i32, %arg0, %c0_i32_0 : i32, i32, i32
  }
}

</mosaic_0001>

<bundles_post_ra>
// kernel: tpu_custom_call.1
= control target key start
LH: loop header
LB: loop body
LE: loop exit
PB: predicated region body
PF: predicated region fallthrough
CT: control target
= control target key end

     0   :  { %9 = vsyncpa [#allocation3], 0  ;;  %s3953_s0 = inlined_call_operand.hbm [shape: s8[1,32,128], index: 0, kind: input, shape index: {}]   ;;  %s3954_s1 = inlined_call_operand.hbm [shape: f32[2,32,256], index: 1, kind: input, shape index: {}]   ;;  %s3955_s2 = inlined_call_operand.hbm [shape: f32[2,32,128], index: 2, kind: output, shape index: {0}]   ;;  %s3956_s3 = inlined_call_operand.hbm [shape: f32[2,32,128], index: 3, kind: output, shape index: {1}]  }
   0x1   :  { %10 = vsyncpa [#allocation6], 0 }
   0x2   :  { %11 = vsyncpa [#allocation4], 0 }
   0x3   :  { %12 = vsyncpa [#allocation9], 0  ;;  %s2305_s12 = smov [#allocation2]   ;;  %s2306_s14 = smov [#allocation5]  }
   0x4   :  { %s19_s13 = sshll.u32 %s2305_s12, 4  ;;  %s28_s15 = sshll.u32 %s2306_s14, 4  ;;  %s20_s13 = int_to_ptr.vmem [resolvable:$true] %s19_s13  ;;  %s2335_s15 = int_to_ptr.vmem [resolvable:$true] %s28_s15 }
   0x5   :  { %s2209_s18 = scalar_lea.hbm %s3953_s0, 128 }
   0x6   :  { %p2210_p0 = scmp.ne.s32.totalorder %s3953_s0, %s2209_s18  ;;  %p2213_p1 = scmp.lt.u32.totalorder %s2209_s18, %s3953_s0 }
   0x8   :  { %p2215_p2 = pnand %p2213_p1, %p2210_p0 }
   0xa   :  { %2218 = shalt.err (!%p2215_p2)
}
   0xb   :  { %s2219_s23 = scalar_lea.vmem %s20_s13, 128  ;;  %p2224_p4 = scmp.lt.s32.totalorder %s20_s13, %s20_s13 }
   0xc   :  { %p2220_p3 = scmp.ne.s32.totalorder %s20_s13, %s2219_s23  ;;  %p2225_p5 = scmp.lt.s32.totalorder %s2219_s23, %s2219_s23 }
   0xe   :  { %p2226_p6 = por %p2225_p5, %p2224_p4 }
  0x10   :  { %p2227_p7 = pnand %p2226_p6, %p2220_p3 }
  0x12   :  { %2230 = shalt.err (!%p2227_p7)
}
  0x13   :  { %22 = dma.hbm_to_vmem [thread:$0]  %s3953_s0, 128, %s20_s13, [#allocation3]  }
  0x14   :  { %s2231_s28 = scalar_lea.hbm %s3954_s1, 2048 }
  0x15   :  { %p2232_p8 = scmp.ne.s32.totalorder %s3954_s1, %s2231_s28  ;;  %p2235_p9 = scmp.lt.u32.totalorder %s2231_s28, %s3954_s1 }
  0x17   :  { %p2237_p10 = pnand %p2235_p9, %p2232_p8 }
  0x19   :  { %2240 = shalt.err (!%p2237_p10)
}
  0x1a   :  { %s2241_s6 = scalar_lea.vmem %s2335_s15, 2048  ;;  %p2246_p12 = scmp.lt.s32.totalorder %s2335_s15, %s2335_s15 }
  0x1b   :  { %p2242_p11 = scmp.ne.s32.totalorder %s2335_s15, %s2241_s6  ;;  %p2247_p13 = scmp.lt.s32.totalorder %s2241_s6, %s2241_s6 }
  0x1d   :  { %p2248_p0 = por %p2247_p13, %p2246_p12 }
  0x1f   :  { %p2249_p1 = pnand %p2248_p0, %p2242_p11 }
  0x21   :  { %2252 = shalt.err (!%p2249_p1)
}
  0x22   :  { %s2307_s0 = smov 256   ;;  %s2308_s7 = smov 16  }
  0x23   :  { %34 = dma.hbm_to_vmem [thread:$0]  %s3954_s1, 2048, %s2335_s15, [#allocation6], %s2307_s0, %s2307_s0, %s2308_s7  }
  0x24   :  { %2297 = dma.done.wait [#allocation3], 128  }
  0x25   :  { %2298 = vsyncadd [#allocation3], 4294967168  ;;  %v42_v0 = vlaneseq }
  0x26   :  { %2299 = dma.done.wait [#allocation6], 2048  }
  0x27   :  { %2300 = vsyncadd [#allocation6], 4294965248  ;;  %v2309_v1 = vmov 0   ;;  %v2367_v2 = vshrl.u32 %v42_v0, 7  ;;  %v2369_v3 = vand.u32 127, %v42_v0  ;;  %v4047_v37 = vmov 0 }
  0x28   :  { %371 = vmatprep.mubr.bf16.mxu0 %v2309_v1  ;;  %v3974_v12 = vmov 1.0|1.0   ;;  %v4053_v42 = vmov 0  ;;  %v4055_v49 = vmov 0  ;;  %v4063_v55 = vmov 0  ;;  %v336_v0 = vld [vmem:[#allocation2] sm:$0xff] }
  0x29   :  { %v44_v4 = vadd.s32 8, %v2367_v2  ;;  %v2373_v5 = vadd.s32 128, %v2369_v3  ;;  %v2376_v6 = vshra.s32 %v2369_v3, 1  ;;  %v2379_v7 = vadd.s32 16, %v2367_v2  ;;  %v423_v51 = vld [vmem:[#allocation5 + $0x8] sm:$0xff]  ;;  %v2843_v60 = vld [vmem:[#allocation5 + $0x30] sm:$0xff] }
  0x2a   :  { %v2382_v8 = vadd.s32 24, %v2367_v2  ;;  %v2391_v10 = vadd.s32 32, %v2367_v2  ;;  %v2394_v11 = vadd.s32 40, %v2367_v2  ;;  %v2414_v13 = vadd.s32 48, %v2367_v2  ;;  %v422_v61 = vld [vmem:[#allocation5] sm:$0xff]  ;;  %s2311_s1 = smov [#allocation7]  }
  0x2b   :  { %v2385_v9 = vshra.s32 %v2373_v5, 1  ;;  %vm224_vm0 = vcmp.eq.s32.totalorder %v2376_v6, %v2367_v2  ;;  %vm226_vm1 = vcmp.eq.s32.totalorder %v2376_v6, %v44_v4  ;;  %vm228_vm8 = vcmp.eq.s32.totalorder %v2376_v6, %v2379_v7  ;;  %s1274_s10 = sshll.u32 %s2311_s1, 4  ;;  %s1275_s10 = int_to_ptr.vmem [resolvable:$true] %s1274_s10 }
  0x2c   :  { %vm1369_vm4 = vmpackc.low %vm226_vm1, %vm224_vm0  ;;  %vm230_vm9 = vcmp.eq.s32.totalorder %v2376_v6, %v2382_v8  ;;  %v2417_v14 = vadd.s32 56, %v2367_v2  ;;  %vm232_vm14 = vcmp.eq.s32.totalorder %v2376_v6, %v2391_v10  ;;  %vm234_vm15 = vcmp.eq.s32.totalorder %v2376_v6, %v2394_v11  ;;  %s2253_s11 = scalar_lea.vmem %s1275_s10, 1024  ;;  %p2258_p3 = scmp.lt.s32.totalorder %s1275_s10, %s1275_s10 }
  0x2d   :  { %vm225_vm2 = vcmp.eq.s32.totalorder %v2385_v9, %v2367_v2  ;;  %vm227_vm3 = vcmp.eq.s32.totalorder %v2385_v9, %v44_v4  ;;  %vm229_vm5 = vcmp.eq.s32.totalorder %v2385_v9, %v2379_v7  ;;  %vm231_vm7 = vcmp.eq.s32.totalorder %v2385_v9, %v2382_v8  ;;  %vm1373_vm13 = vmpackc.low %vm230_vm9, %vm228_vm8  ;;  %p2254_p2 = scmp.ne.s32.totalorder %s1275_s10, %s2253_s11  ;;  %p2259_p4 = scmp.lt.s32.totalorder %s2253_s11, %s2253_s11 }
  0x2e   :  { %vm1367_vm6 = vmpackc.low %vm227_vm3, %vm225_vm2  ;;  %vm233_vm11 = vcmp.eq.s32.totalorder %v2385_v9, %v2391_v10  ;;  %vm235_vm12 = vcmp.eq.s32.totalorder %v2385_v9, %v2394_v11  ;;  %v2425_v15 = vadd.s32 64, %v2367_v2  ;;  %v2428_v16 = vadd.s32 72, %v2367_v2 }
  0x2f   :  { %1368 = vmatprep.subr.msk.bf16.mxu0 %vm1367_vm6, %v3974_v12  ;;  %vm1371_vm10 = vmpackc.low %vm231_vm7, %vm229_vm5  ;;  %vm237_vm1 = vcmp.eq.s32.totalorder %v2385_v9, %v2414_v13  ;;  %vm239_vm2 = vcmp.eq.s32.totalorder %v2385_v9, %v2417_v14  ;;  %v77_v17 = vshra.s32 %v2367_v2, 1  ;;  %v78_v18 = vshra.s32 %v44_v4, 1  ;;  %p2260_p5 = por %p2259_p4, %p2258_p3 }
  0x30   :  { %1370 = vmatpush1.bf16.msk.msra.mxu0 %vm1369_vm4, %v3974_v12  ;;  %vm1375_vm0 = vmpackc.low %vm235_vm12, %vm233_vm11  ;;  %vm236_vm5 = vcmp.eq.s32.totalorder %v2376_v6, %v2414_v13  ;;  %vm238_vm6 = vcmp.eq.s32.totalorder %v2376_v6, %v2417_v14  ;;  %vm241_vm7 = vcmp.eq.s32.totalorder %v2385_v9, %v2425_v15  ;;  %vm243_vm8 = vcmp.eq.s32.totalorder %v2385_v9, %v2428_v16 }
  0x31   :  { %1372 = vmatprep.subr.msk.bf16.mxu0 %vm1371_vm10, %v3974_v12  ;;  %vm1377_vm3 = vmpackc.low %vm234_vm15, %vm232_vm14  ;;  %v2446_v19 = vadd.s32 80, %v2367_v2  ;;  %v2449_v20 = vadd.s32 88, %v2367_v2  ;;  %v55_v21 = vadd.s32 96, %v2367_v2  ;;  %v56_v22 = vadd.s32 104, %v2367_v2  ;;  %p2261_p6 = pnand %p2260_p5, %p2254_p2 }
  0x32   :  { %vm1379_vm4 = vmpackc.low %vm239_vm2, %vm237_vm1  ;;  %vm240_vm11 = vcmp.eq.s32.totalorder %v2376_v6, %v2425_v15  ;;  %vm242_vm12 = vcmp.eq.s32.totalorder %v2376_v6, %v2428_v16  ;;  %v2460_v25 = vadd.s32 112, %v2367_v2  ;;  %v2463_v26 = vadd.s32 120, %v2367_v2 }
  0x33   :  { %vm1381_vm9 = vmpackc.low %vm238_vm6, %vm236_vm5  ;;  %v89_v23 = vshra.s32 %v55_v21, 1  ;;  %v90_v24 = vshra.s32 %v56_v22, 1  ;;  %vm2471_vm14 = vcmp.eq.s32.totalorder %v78_v18, %v2369_v3  ;;  %vm245_vm15 = vcmp.eq.s32.totalorder %v2385_v9, %v2446_v19 }
  0x34   :  { %1374 = vmatpush1.bf16.msk.msra.mxu0 %vm1373_vm13, %v3974_v12  ;;  %vm1383_vm10 = vmpackc.low %vm243_vm8, %vm241_vm7  ;;  %vm2466_vm13 = vcmp.eq.s32.totalorder %v77_v17, %v2369_v3  ;;  %vm244_vm1 = vcmp.eq.s32.totalorder %v2376_v6, %v2446_v19  ;;  %vm246_vm2 = vcmp.eq.s32.totalorder %v2376_v6, %v2449_v20  ;;  %v91_v29 = vshra.s32 %v2460_v25, 1 }
  0x35   :  { %1376 = vmatprep.subr.msk.bf16.mxu0 %vm1375_vm0, %v3974_v12  ;;  %vm247_vm0 = vcmp.eq.s32.totalorder %v2385_v9, %v2449_v20  ;;  %v92_v30 = vshra.s32 %v2463_v26, 1  ;;  %vm122_vm5 = vcmp.eq.s32.totalorder %v90_v24, %v2369_v3  ;;  %v59_v32 = vadd.s32 128, %v2367_v2 }
  0x36   :  { %v60_v33 = vadd.s32 136, %v2367_v2  ;;  %vm2495_vm6 = vmpackc.low %vm247_vm0, %vm245_vm15  ;;  %vm249_vm7 = vcmp.eq.s32.totalorder %v2385_v9, %v55_v21  ;;  %vm251_vm8 = vcmp.eq.s32.totalorder %v2385_v9, %v56_v22  ;;  %v61_v35 = vadd.s32 144, %v2367_v2 }
  0x37   :  { %v62_v36 = vadd.s32 152, %v2367_v2  ;;  %v93_v40 = vshra.s32 %v59_v32, 1  ;;  %v63_v45 = vadd.s32 160, %v2367_v2  ;;  %v64_v46 = vadd.s32 168, %v2367_v2  ;;  %vm1391_vm0 = vmpackc.low %vm251_vm8, %vm249_vm7 }
  0x38   :  { %1378 = vmatpush1.bf16.msk.msra.mxu0 %vm1377_vm3, %v3974_v12  ;;  %vm1385_vm3 = vmpackc.low %vm242_vm12, %vm240_vm11  ;;  %vm2517_vm11 = vcmp.eq.s32.totalorder %v92_v30, %v2369_v3  ;;  %v94_v41 = vshra.s32 %v60_v33, 1  ;;  %v95_v43 = vshra.s32 %v61_v35, 1  ;;  %vm250_vm15 = vcmp.eq.s32.totalorder %v2376_v6, %v56_v22 }
  0x39   :  { %1380 = vmatprep.subr.msk.bf16.mxu0 %vm1379_vm4, %v3974_v12  ;;  %vm2488_vm4 = vcmp.eq.s32.totalorder %v89_v23, %v2369_v3  ;;  %v96_v44 = vshra.s32 %v62_v36, 1  ;;  %v79_v47 = vshra.s32 %v2379_v7, 1  ;;  %v80_v48 = vshra.s32 %v2382_v8, 1 }
  0x3a   :  { %vm2524_vm12 = vmpackc.low %vm122_vm5, %vm2488_vm4  ;;  %vm126_vm4 = vcmp.eq.s32.totalorder %v94_v41, %v2369_v3  ;;  %vm2567_vm7 = vcmp.eq.s32.totalorder %v95_v43, %v2369_v3  ;;  %v97_v53 = vshra.s32 %v63_v45, 1  ;;  %v98_v54 = vshra.s32 %v64_v46, 1 }
  0x3b   :  { %v4054_v42 = vsel %vm2524_vm12, 4294967295, %v4053_v42  ;;  %vm2572_vm8 = vcmp.eq.s32.totalorder %v96_v44, %v2369_v3  ;;  %v65_v56 = vadd.s32 176, %v2367_v2  ;;  %v66_v57 = vadd.s32 184, %v2367_v2 }
  0x3c   :  { %1382 = vmatpush1.bf16.msk.msra.mxu0 %vm1381_vm9, %v3974_v12  ;;  %vm2507_vm9 = vmpackc.low %vm2471_vm14, %vm2466_vm13  ;;  %vm248_vm14 = vcmp.eq.s32.totalorder %v2376_v6, %v55_v21  ;;  %v81_v58 = vshra.s32 %v2391_v10, 1  ;;  %v82_v62 = vshra.s32 %v2394_v11, 1  ;;  %v4072_v63 = vmov 0 }
  0x3d   :  { %1384 = vmatprep.subr.msk.bf16.mxu0 %vm1383_vm10, %v3974_v12  ;;  %v4048_v37 = vsel %vm2507_vm9, 4294967295, %v4047_v37  ;;  %vm2512_vm10 = vcmp.eq.s32.totalorder %v91_v29, %v2369_v3  ;;  %vm1389_vm13 = vmpackc.low %vm246_vm2, %vm244_vm1  ;;  %vm253_vm1 = vcmp.eq.s32.totalorder %v2385_v9, %v2460_v25  ;;  %vm255_vm2 = vcmp.eq.s32.totalorder %v2385_v9, %v2463_v26 }
  0x3e   :  { %vm2557_vm5 = vmpackc.low %vm2517_vm11, %vm2512_vm10  ;;  %v67_v7 = vadd.s32 192, %v2367_v2  ;;  %v68_v8 = vadd.s32 200, %v2367_v2  ;;  %v99_v9 = vshra.s32 %v65_v56, 1  ;;  %v100_v10 = vshra.s32 %v66_v57, 1  ;;  %v2837_v56 = vld [vmem:[#allocation5 + $0x20] sm:$0xff] }
  0x3f   :  { %v4056_v49 = vsel %vm2557_vm5, 4294967295, %v4055_v49  ;;  %vm2584_vm11 = vmpackc.low %vm255_vm2, %vm253_vm1  ;;  %vm130_vm1 = vcmp.eq.s32.totalorder %v98_v54, %v2369_v3  ;;  %v4076_v11 = vmov 0  ;;  %v84_v21 = vshra.s32 %v2417_v14, 1  ;;  %v2835_v54 = vld [vmem:[#allocation5 + $0x18] sm:$0xff] }
  0x40   :  { %1386 = vmatpush1.bf16.msk.msra.mxu0 %vm1385_vm3, %v3974_v12  ;;  %vm125_vm3 = vcmp.eq.s32.totalorder %v93_v40, %v2369_v3  ;;  %v337_v22 = vunpack.c.l.s8.bf16 %v336_v0  ;;  %v102_v24 = vshra.s32 %v68_v8, 1  ;;  %v69_v14 = vadd.s32 208, %v2367_v2 }
  0x41   :  { %1388 = vmatprep.subr.msk.bf16.mxu0 %vm2495_vm6, %v3974_v12  ;;  %vm2562_vm6 = vmpackc.low %vm250_vm15, %vm248_vm14  ;;  %vm254_vm14 = vcmp.eq.s32.totalorder %v2376_v6, %v2463_v26  ;;  %vm2596_vm15 = vcmp.eq.s32.totalorder %v79_v47, %v2369_v3  ;;  %v85_v27 = vshra.s32 %v2425_v15, 1  ;;  %v86_v28 = vshra.s32 %v2428_v16, 1 }
  0x42   :  { %vm2577_vm10 = vmpackc.low %vm126_vm4, %vm125_vm3  ;;  %vm2621_vm4 = vcmp.eq.s32.totalorder %v97_v53, %v2369_v3  ;;  %v4086_v29 = vmov 0  ;;  %v103_v15 = vshra.s32 %v69_v14, 1  ;;  %v87_v30 = vshra.s32 %v2446_v19, 1  ;;  %v424_v53 = vld [vmem:[#allocation5 + $0x10] sm:$0xff] }
  0x43   :  { %v4064_v55 = vsel %vm2577_vm10, 4294967295, %v4063_v55  ;;  %1831 = vmatprep.subr.msk.bf16.mxu1 %vm2577_vm10, %v3974_v12  ;;  %vm2610_vm3 = vmpackc.low %vm2572_vm8, %vm2567_vm7  ;;  %vm2649_vm7 = vcmp.eq.s32.totalorder %v81_v58, %v2369_v3  ;;  %vm2654_vm8 = vcmp.eq.s32.totalorder %v82_v62, %v2369_v3  ;;  %v88_v31 = vshra.s32 %v2449_v20, 1 }
  0x44   :  { %1390 = vmatpush1.bf16.msk.msra.mxu0 %vm1389_vm13, %v3974_v12  ;;  %4065 = vst [vmem:[#allocation14_spill] sm:$0xff] %v4064_v55  ;;  %vm252_vm13 = vcmp.eq.s32.totalorder %v2376_v6, %v2460_v25  ;;  %v4073_v63 = vsel %vm2610_vm3, 4294967295, %v4072_v63  ;;  %1832 = vmatpush3.bf16.msk.msra.mxu1 %vm2507_vm9, %v3974_v12  ;;  %v83_v6 = vshra.s32 %v2414_v13, 1  ;;  %v101_v13 = vshra.s32 %v67_v7, 1  ;;  %v2847_v7 = vld [vmem:[#allocation5 + $0x40] sm:$0xff]  ;;  %v2934_v55 = vld [vmem:[#allocation5 + $0x58] sm:$0xff] }
  0x45   :  { %1392 = vmatprep.subr.msk.bf16.mxu0 %vm1391_vm0, %v3974_v12  ;;  %vm2601_vm0 = vcmp.eq.s32.totalorder %v80_v48, %v2369_v3  ;;  %1833 = vmatprep.subr.msk.bf16.mxu1 %vm2610_vm3, %v3974_v12  ;;  %vm1397_vm2 = vmpackc.low %vm254_vm14, %vm252_vm13  ;;  %v70_v25 = vadd.s32 216, %v2367_v2  ;;  %vm131_vm13 = vcmp.eq.s32.totalorder %v99_v9, %v2369_v3  ;;  %vm132_vm14 = vcmp.eq.s32.totalorder %v100_v10, %v2369_v3 }
  0x46   :  { %v338_v32 = vunpack.c.h.s8.bf16 %v336_v0  ;;  %v4090_v33 = vmov 0  ;;  %v71_v35 = vadd.s32 224, %v2367_v2  ;;  %v72_v36 = vadd.s32 232, %v2367_v2  ;;  %4102 = vst [vmem:[#allocation15_spill] sm:$0xff] %v2847_v7  ;;  %4116 = vst [vmem:[#allocation24_spill] sm:$0xff] %v2934_v55 }
  0x47   :  { %v104_v16 = vshra.s32 %v70_v25, 1  ;;  %v4098_v40 = vmov 0  ;;  %v73_v41 = vadd.s32 240, %v2367_v2  ;;  %v74_v43 = vadd.s32 248, %v2367_v2 }
  0x48   :  { %1394 = vmatpush1.bf16.msk.msra.mxu0 %vm2562_vm6, %v3974_v12  ;;  %vm2644_vm6 = vmpackc.low %vm2601_vm0, %vm2596_vm15  ;;  %vm115_vm0 = vcmp.eq.s32.totalorder %v83_v6, %v2369_v3  ;;  %v105_v38 = vshra.s32 %v71_v35, 1  ;;  %v106_v39 = vshra.s32 %v72_v36, 1  ;;  %v4100_v46 = vmov 0 }
  0x49   :  { %1396 = vmatprep.subr.msk.bf16.mxu0 %vm2584_vm11, %v3974_v12  ;;  %v4077_v11 = vsel %vm2644_vm6, 4294967295, %v4076_v11  ;;  %vm2662_vm11 = vmpackc.low %vm130_vm1, %vm2621_vm4  ;;  %1834 = vmatpush3.bf16.msk.msra.mxu1 %vm2644_vm6, %v3974_v12  ;;  %vm116_vm4 = vcmp.eq.s32.totalorder %v84_v21, %v2369_v3  ;;  %v107_v44 = vshra.s32 %v73_v41, 1  ;;  %v108_v45 = vshra.s32 %v74_v43, 1 }
  0x4a   :  { %1835 = vmatprep.subr.msk.bf16.mxu1 %vm2662_vm11, %v3974_v12  ;;  %vm2684_vm15 = vmpackc.low %vm2654_vm8, %vm2649_vm7  ;;  %vm134_vm7 = vcmp.eq.s32.totalorder %v102_v24, %v2369_v3  ;;  %v2828_v2 = vand.u32 1, %v2369_v3  ;;  %v2831_v47 = vand.u32 1, %v2373_v5  ;;  %v2845_v5 = vld [vmem:[#allocation5 + $0x38] sm:$0xff]  ;;  %v2851_v10 = vpack.c.bf16 %v424_v53, %v422_v61 }
  0x4b   :  { %vm2699_vm1 = vmpackc.low %vm132_vm14, %vm131_vm13  ;;  %vm117_vm13 = vcmp.eq.s32.totalorder %v85_v27, %v2369_v3  ;;  %vm118_vm14 = vcmp.eq.s32.totalorder %v86_v28, %v2369_v3  ;;  %v2854_v6 = vpack.c.bf16 %v2835_v54, %v423_v51  ;;  %v4109_v36 = vmov 0 }
  0x4c   :  { %1398 = vmatpush1.bf16.msk.msra.mxu0 %vm1397_vm2, %v3974_v12  ;;  %v4087_v29 = vsel %vm2699_vm1, 4294967295, %v4086_v29  ;;  %vm133_vm2 = vcmp.eq.s32.totalorder %v101_v13, %v2369_v3  ;;  %vm2711_vm8 = vmpackc.low %vm116_vm4, %vm115_vm0  ;;  %vm135_vm0 = vcmp.eq.s32.totalorder %v103_v15, %v2369_v3  ;;  %vm136_vm4 = vcmp.eq.s32.totalorder %v104_v16, %v2369_v3  ;;  %4103 = vst [vmem:[#allocation16_spill] sm:$0xff] %v2851_v10  ;;  %v2866_v13 = vld [vmem:[#allocation5 + $0x48] sm:$0xff]  ;;  %v2880_v16 = vld [vmem:[#allocation5 + $0x50] sm:$0xff] }
  0x4d   :  { %1859 = vmatprep.subr.msk.bf16.mxu0 %vm2577_vm10, %v3974_v12  ;;  %1836 = vmatpush3.bf16.msk.msra.mxu1 %vm2684_vm15, %v3974_v12  ;;  %v410_v48 = vadd.s32 1, %v2828_v2  ;;  %v411_v50 = vadd.s32 1, %v2831_v47  ;;  %4104 = vst [vmem:[#allocation17_spill] sm:$0xff] %v2854_v6  ;;  %4107 = vst [vmem:[#allocation20_spill] sm:$0xff] %v2866_v13  ;;  %v4113_v43 = vmov 0 }
  0x4e   :  { %1837 = vmatprep.subr.msk.bf16.mxu1 %vm2699_vm1, %v3974_v12  ;;  %4108 = vst [vmem:[#allocation21_spill] sm:$0xff] %v2880_v16 }
  0x4f   :  { %372 = vmatmul.mubr.bf16.vlgmr.msra.gmra.mrb[0].mxu0 %v337_v22  ;;  %v2839_v58 = vand.u32 1, %v410_v48  ;;  %v2849_v8 = vand.u32 1, %v411_v50  ;;  %v2862_v22 = vpack.c.bf16 %v2843_v60, %v2837_v56 }
  0x50   :  { %381 = vmatprep.mubr.bf16.mxu0 %v2309_v1  ;;  %1860 = vmatpush3.bf16.msk.msra.mxu0 %vm2507_vm9, %v3974_v12  ;;  %vm2719_vm9 = vmpackc.low %vm134_vm7, %vm133_vm2  ;;  %vm119_vm7 = vcmp.eq.s32.totalorder %v87_v30, %v2369_v3 }
  0x51   :  { %1861 = vmatprep.subr.msk.bf16.mxu0 %vm2610_vm3, %v3974_v12  ;;  %v4091_v33 = vsel %vm2719_vm9, 4294967295, %v4090_v33  ;;  %1838 = vmatpush3.bf16.msk.msra.mxu1 %vm2711_vm8, %v3974_v12  ;;  %vm2737_vm2 = vmpackc.low %vm118_vm14, %vm117_vm13  ;;  %vm138_vm14 = vcmp.eq.s32.totalorder %v106_v39, %v2369_v3  ;;  %4106 = vst [vmem:[#allocation19_spill] sm:$0xff] %v2862_v22 }
  0x52   :  { %1839 = vmatprep.subr.msk.bf16.mxu1 %vm2719_vm9, %v3974_v12  ;;  %vm2743_vm3 = vmpackc.low %vm136_vm4, %vm135_vm0  ;;  %vm139_vm4 = vcmp.eq.s32.totalorder %v107_v44, %v2369_v3 }
  0x54   :  { %1862 = vmatpush3.bf16.msk.msra.mxu0 %vm2644_vm6, %v3974_v12  ;;  %vm120_vm6 = vcmp.eq.s32.totalorder %v88_v31, %v2369_v3 }
  0x55   :  { %1863 = vmatprep.subr.msk.bf16.mxu0 %vm2662_vm11, %v3974_v12  ;;  %1840 = vmatpush3.bf16.msk.msra.mxu1 %vm2737_vm2, %v3974_v12  ;;  %vm2759_vm13 = vmpackc.low %vm120_vm6, %vm119_vm7  ;;  %vm137_vm6 = vcmp.eq.s32.totalorder %v105_v38, %v2369_v3  ;;  %vm140_vm7 = vcmp.eq.s32.totalorder %v108_v45, %v2369_v3  ;;  %v2841_v3 = vld [vmem:[#allocation5 + $0x28] sm:$0xff] }
  0x56   :  { %1841 = vmatprep.subr.msk.bf16.mxu1 %vm2743_vm3, %v3974_v12  ;;  %vm2785_vm0 = vmpackc.low %vm138_vm14, %vm137_vm6  ;;  %v2858_v21 = vpack.c.bf16 %v2845_v5, %v2841_v3 }
  0x57   :  { %382 = vmatmul.mubr.bf16.gmra.mrb[4].mxu0 %v338_v32  ;;  %v4099_v40 = vsel %vm2785_vm0, 4294967295, %v4098_v40  ;;  %vm2805_vm6 = vmpackc.low %vm140_vm7, %vm139_vm4 }
  0x58   :  { %1864 = vmatpush3.bf16.msk.msra.mxu0 %vm2684_vm15, %v3974_v12  ;;  %v4101_v46 = vsel %vm2805_vm6, 4294967295, %v4100_v46  ;;  %4105 = vst [vmem:[#allocation18_spill] sm:$0xff] %v2858_v21 }
  0x59   :  { %1865 = vmatprep.subr.msk.bf16.mxu0 %vm2699_vm1, %v3974_v12  ;;  %1842 = vmatpush3.bf16.msk.msra.mxu1 %vm2759_vm13, %v3974_v12 }
  0x5a   :  { %1843 = vmatprep.subr.msk.bf16.mxu1 %vm2785_vm0, %v3974_v12 }
  0x5c   :  { %1866 = vmatpush3.bf16.msk.msra.mxu0 %vm2711_vm8, %v3974_v12 }
  0x5d   :  { %1867 = vmatprep.subr.msk.bf16.mxu0 %vm2719_vm9, %v3974_v12  ;;  %1844 = vmatpush3.bf16.msk.msra.mxu1 %vm2524_vm12, %v3974_v12 }
  0x5e   :  { %1845 = vmatprep.subr.msk.bf16.mxu1 %vm2805_vm6, %v3974_v12 }
  0x60   :  { %1868 = vmatpush3.bf16.msk.msra.mxu0 %vm2737_vm2, %v3974_v12 }
  0x61   :  { %1869 = vmatprep.subr.msk.bf16.mxu0 %vm2743_vm3, %v3974_v12  ;;  %1846 = vmatpush3.bf16.msk.msra.mxu1 %vm2557_vm5, %v3974_v12 }
  0x62   :  { %1887 = vmatprep.subr.msk.bf16.mxu1 %vm2577_vm10, %v3974_v12 }
  0x64   :  { %1870 = vmatpush3.bf16.msk.msra.mxu0 %vm2759_vm13, %v3974_v12 }
  0x65   :  { %1871 = vmatprep.subr.msk.bf16.mxu0 %vm2785_vm0, %v3974_v12 }
  0x68   :  { %1872 = vmatpush3.bf16.msk.msra.mxu0 %vm2524_vm12, %v3974_v12 }
  0x69   :  { %1873 = vmatprep.subr.msk.bf16.mxu0 %vm2805_vm6, %v3974_v12 }
  0x6c   :  { %1874 = vmatpush3.bf16.msk.msra.mxu0 %vm2557_vm5, %v3974_v12 }
  0x6d   :  { %1915 = vmatprep.subr.msk.bf16.mxu0 %vm2577_vm10, %v3974_v12 }
 0x122   :  { %v373_v52 = vpop.f32.mrb[0].mxu0 }
 0x123   :  { %v2183_v57 = vtrunc.f32 %v373_v52  ;;  %v375_v59 = vpop.f32.mrb[1].mxu0 }
 0x124   :  { %v2185_v62 = vtrunc.f32 %v375_v59  ;;  %v377_v0 = vpop.f32.mrb[2].mxu0 }
 0x125   :  { %v2184_v4 = vcvt.f32.s32 %v2183_v57  ;;  %v2187_v9 = vtrunc.f32 %v377_v0  ;;  %v379_v17 = vpop.f32.mrb[3].mxu0 }
 0x126   :  { %v2186_v18 = vcvt.f32.s32 %v2185_v62  ;;  %v2189_v14 = vtrunc.f32 %v379_v17 }
 0x127   :  { %vm402_vm14 = vcmp.eq.s32.totalorder %v2184_v4, %v2828_v2  ;;  %vm3969_vm4 = vcmp.eq.s32.totalorder %v2184_v4, %v2839_v58  ;;  %v2188_v24 = vcvt.f32.s32 %v2187_v9  ;;  %vm4112_vm12 = vcmp.eq.s32.totalorder %v2184_v4, %v2839_v58 }
 0x128   :  { %v2870_v25 = vsel %vm402_vm14, %v422_v61, 0.0  ;;  %v637_v27 = vsel %vm3969_vm4, %v422_v61, 0.0  ;;  %v853_v28 = vsel %vm402_vm14, %v2847_v7, 0.0  ;;  %v1061_v15 = vsel %vm3969_vm4, %v2847_v7, 0.0 }
 0x129   :  { %vm403_vm7 = vcmp.eq.s32.totalorder %v2186_v18, %v2831_v47  ;;  %vm415_vm10 = vcmp.eq.s32.totalorder %v2186_v18, %v2849_v8  ;;  %vm404_vm5 = vcmp.eq.s32.totalorder %v2188_v24, %v2828_v2  ;;  %vm416_vm6 = vcmp.eq.s32.totalorder %v2188_v24, %v2839_v58 }
 0x12a   :  { %v2888_v30 = vsel %vm403_vm7, %v423_v51, 0.0  ;;  %v2892_v31 = vsel %vm415_vm10, %v423_v51, 0.0  ;;  %v2897_v32 = vsel %vm403_vm7, %v2866_v13, 0.0  ;;  %v2902_v35 = vsel %vm415_vm10, %v2866_v13, 0.0  ;;  %vm2906_vm4 = vmpackc.low %vm404_vm5, %vm402_vm14  ;;  %v383_v38 = vpop.f32.mrb[4].mxu0 }
 0x12b   :  { %v4110_v36 = vsel %vm2906_vm4, 4294967295, %v4109_v36  ;;  %v2910_v39 = vsel %vm404_vm5, %v424_v53, 0.0  ;;  %v639_v41 = vsel %vm416_vm6, %v424_v53, 0.0  ;;  %vm2914_vm0 = vmpackc.low %vm416_vm6, %vm4112_vm12  ;;  %v855_v44 = vsel %vm404_vm5, %v2880_v16, 0.0  ;;  %v2920_v48 = vpop.f32.mrb[5].mxu0 }
 0x12c   :  { %4111 = vst [vmem:[#allocation22_spill] sm:$0xff] %v4110_v36  ;;  %v4114_v43 = vsel %vm2914_vm0, 4294967295, %v4113_v43  ;;  %v1063_v45 = vsel %vm416_vm6, %v2880_v16, 0.0  ;;  %v2924_v50 = vpack.c.bf16 %v2910_v39, %v2870_v25  ;;  %v645_v51 = vpack.c.bf16 %v639_v41, %v637_v27  ;;  %v2926_v53 = vpop.f32.mrb[6].mxu0 }
 0x12d   :  { %4115 = vst [vmem:[#allocation23_spill] sm:$0xff] %v4114_v43  ;;  %v861_v52 = vpack.c.bf16 %v855_v44, %v853_v28  ;;  %v1069_v57 = vpack.c.bf16 %v1063_v45, %v1061_v15  ;;  %v2190_v59 = vcvt.f32.s32 %v2189_v14  ;;  %v2191_v61 = vtrunc.f32 %v383_v38  ;;  %v2930_v4 = vpop.f32.mrb[7].mxu0 }
 0x12e   :  { %v2193_v62 = vtrunc.f32 %v2920_v48  ;;  %v2195_v0 = vtrunc.f32 %v2926_v53  ;;  %v649_v9 = vunpack.c.l.bf16 %v645_v51  ;;  %v651_v17 = vunpack.c.h.bf16 %v645_v51 }
 0x12f   :  { %v865_v24 = vunpack.c.l.bf16 %v861_v52  ;;  %v867_v12 = vunpack.c.h.bf16 %v861_v52  ;;  %v1073_v16 = vunpack.c.l.bf16 %v1069_v57  ;;  %v1075_v7 = vunpack.c.h.bf16 %v1069_v57 }
 0x130   :  { %vm405_vm12 = vcmp.eq.s32.totalorder %v2190_v59, %v2831_v47  ;;  %vm417_vm5 = vcmp.eq.s32.totalorder %v2190_v59, %v2849_v8  ;;  %v657_v43 = vsub.f32 %v637_v27, %v649_v9  ;;  %v659_v13 = vsub.f32 %v639_v41, %v651_v17 }
 0x131   :  { %v873_v14 = vsub.f32 %v853_v28, %v865_v24  ;;  %v875_v38 = vsub.f32 %v855_v44, %v867_v12  ;;  %vm2940_vm6 = vmpackc.low %vm405_vm12, %vm403_vm7  ;;  %v4117_v48 = vmov 0  ;;  %v1081_v51 = vsub.f32 %v1061_v15, %v1073_v16 }
 0x132   :  { %v4118_v48 = vsel %vm2940_vm6, 4294967295, %v4117_v48  ;;  %v1083_v52 = vsub.f32 %v1063_v45, %v1075_v7  ;;  %v2947_v57 = vsel %vm405_vm12, %v2835_v54, 0.0  ;;  %v2952_v12 = vsel %vm417_vm5, %v2835_v54, 0.0  ;;  %1465 = vmatprep.mubr.msk.bf16.mxu0 %vm2940_vm6, %v2854_v6  ;;  %vm2961_vm14 = vmpackc.low %vm417_vm5, %vm415_vm10  ;;  %v3020_v6 = vld [vmem:[#allocation5 + $0x60] sm:$0xff] }
 0x133   :  { %4119 = vst [vmem:[#allocation25_spill] sm:$0xff] %v4118_v48  ;;  %v4120_v7 = vmov 0  ;;  %v2965_v27 = vpack.c.bf16 %v659_v13, %v657_v43  ;;  %v2967_v28 = vpack.c.bf16 %v875_v38, %v873_v14  ;;  %v2971_v54 = vpack.c.bf16 %v2947_v57, %v2888_v30  ;;  %1468 = vmatmul.mubr.msk.bf16.vlgmr.msra.gmra.mrb[8].mxu0 %vm2906_vm4, %v2851_v10  ;;  %4133 = vst [vmem:[#allocation34_spill] sm:$0xff] %v3020_v6 }
 0x134   :  { %v4121_v7 = vsel %vm2961_vm14, 4294967295, %v4120_v7  ;;  %v2975_v15 = vpack.c.bf16 %v2952_v12, %v2892_v31  ;;  %v2980_v18 = vpack.c.bf16 %v1083_v52, %v1081_v51  ;;  %v2985_v16 = vsel %vm405_vm12, %v2934_v55, 0.0 }
 0x135   :  { %4122 = vst [vmem:[#allocation26_spill] sm:$0xff] %v4121_v7  ;;  %4123 = vst [vmem:[#allocation27_spill] sm:$0xff] %v2965_v27  ;;  %v2990_v41 = vsel %vm417_vm5, %v2934_v55, 0.0  ;;  %v2192_v44 = vcvt.f32.s32 %v2191_v61  ;;  %v4126_v45 = vmov 1.0|1.0   ;;  %vm4127_vm10 = vnez %v4048_v37 }
 0x136   :  { %4124 = vst [vmem:[#allocation28_spill] sm:$0xff] %v2967_v28  ;;  %4125 = vst [vmem:[#allocation29_spill] sm:$0xff] %v2980_v18  ;;  %1916 = vmatpush3.bf16.msk.msra.mxu0 %vm4127_vm10, %v4126_v45  ;;  %v669_v53 = vunpack.c.l.bf16 %v2965_v27  ;;  %v671_v9 = vunpack.c.h.bf16 %v2965_v27  ;;  %v885_v17 = vunpack.c.l.bf16 %v2967_v28  ;;  %v887_v24 = vunpack.c.h.bf16 %v2967_v28 }
 0x137   :  { %vm4128_vm7 = vnez %v4073_v63  ;;  %v1093_v59 = vunpack.c.l.bf16 %v2980_v18  ;;  %v1095_v61 = vunpack.c.h.bf16 %v2980_v18  ;;  %v3006_v36 = vpack.c.bf16 %v2985_v16, %v2897_v32 }
 0x138   :  { %1917 = vmatprep.subr.msk.bf16.mxu0 %vm4128_vm7, %v4126_v45  ;;  %v3010_v10 = vpack.c.bf16 %v2990_v41, %v2902_v35  ;;  %v3012_v48 = vsub.f32 %v657_v43, %v669_v53  ;;  %v3014_v55 = vsub.f32 %v659_v13, %v671_v9  ;;  %v3016_v28 = vsub.f32 %v873_v14, %v885_v17 }
 0x139   :  { %v3018_v7 = vsub.f32 %v875_v38, %v887_v24  ;;  %v3022_v27 = vsub.f32 %v1081_v51, %v1093_v59  ;;  %v3024_v18 = vsub.f32 %v1083_v52, %v1095_v61  ;;  %vm3995_vm12 = vcmp.eq.s32.totalorder %v2192_v44, %v2828_v2  ;;  %v3067_v51 = vld [vmem:[#allocation5 + $0x70] sm:$0xff] }
 0x13a   :  { %4129 = vst [vmem:[#allocation30_spill] sm:$0xff] %v3012_v48  ;;  %4130 = vst [vmem:[#allocation31_spill] sm:$0xff] %v3014_v55  ;;  %vm3996_vm5 = vcmp.eq.s32.totalorder %v2192_v44, %v2839_v58  ;;  %vm4136_vm4 = vnez %v4077_v11  ;;  %v3038_v14 = vsel %vm3995_vm12, %v2837_v56, 0.0  ;;  %v3053_v52 = vsel %vm3995_vm12, %v3020_v6, 0.0 }
 0x13b   :  { %4131 = vst [vmem:[#allocation32_spill] sm:$0xff] %v3016_v28  ;;  %4132 = vst [vmem:[#allocation33_spill] sm:$0xff] %v3018_v7  ;;  %1918 = vmatpush3.bf16.msk.msra.mxu0 %vm4136_vm4, %v4126_v45  ;;  %v3043_v38 = vsel %vm3996_vm5, %v2837_v56, 0.0  ;;  %v3058_v53 = vsel %vm3996_vm5, %v3020_v6, 0.0  ;;  %v2194_v9 = vcvt.f32.s32 %v2193_v62  ;;  %v3060_v56 = vld [vmem:[#allocation5 + $0x68] sm:$0xff]  ;;  %v2196_v17 = vcvt.f32.s32 %v2195_v0  ;;  %v3108_v6 = vld [vmem:[#allocation5 + $0x78] sm:$0xff] }
 0x13c   :  { %4134 = vst [vmem:[#allocation35_spill] sm:$0xff] %v3022_v27  ;;  %4135 = vst [vmem:[#allocation36_spill] sm:$0xff] %v3024_v18  ;;  %1919 = vmatprep.subr.msk.bf16.mxu0 %vm2662_vm11, %v4126_v45  ;;  %v2197_v24 = vtrunc.f32 %v2930_v4  ;;  %v443_v59 = vunpack.c.l.bf16 %v2971_v54  ;;  %v445_v61 = vunpack.c.h.bf16 %v2971_v54  ;;  %v442_v43 = vunpack.c.l.bf16 %v2924_v50 }
 0x13d   :  { %4137 = vst [vmem:[#allocation37_spill] sm:$0xff] %v3058_v53  ;;  %4138 = vst [vmem:[#allocation38_spill] sm:$0xff] %v3060_v56  ;;  %vm4004_vm0 = vcmp.eq.s32.totalorder %v2194_v9, %v2831_v47  ;;  %vm4003_vm12 = vcmp.eq.s32.totalorder %v2194_v9, %v2849_v8  ;;  %v444_v13 = vunpack.c.h.bf16 %v2924_v50  ;;  %vm408_vm5 = vcmp.eq.s32.totalorder %v2196_v17, %v2828_v2 }
 0x13e   :  { %4139 = vst [vmem:[#allocation39_spill] sm:$0xff] %v3067_v51  ;;  %v435_v62 = vsel %vm4004_vm0, %v2841_v3, 0.0  ;;  %v3080_v0 = vsel %vm4003_vm12, %v2841_v3, 0.0  ;;  %v3085_v4 = vsel %vm4004_vm0, %v3060_v56, 0.0  ;;  %v3090_v50 = vsel %vm4003_vm12, %v3060_v56, 0.0  ;;  %4142 = vst [vmem:[#allocation42_spill] sm:$0xff] %v3108_v6 }
 0x13f   :  { %1920 = vmatpush3.bf16.msk.msra.mxu0 %vm2684_vm15, %v4126_v45  ;;  %4140 = vst [vmem:[#allocation40_spill] sm:$0xff] %v3090_v50  ;;  %vm420_vm6 = vcmp.eq.s32.totalorder %v2196_v17, %v2839_v58  ;;  %v2198_v3 = vcvt.f32.s32 %v2197_v24  ;;  %v451_v54 = vsub.f32 %v2888_v30, %v443_v59  ;;  %v436_v27 = vsel %vm408_vm5, %v2843_v60, 0.0 }
 0x140   :  { %1921 = vmatprep.subr.msk.bf16.mxu0 %vm2699_vm1, %v4126_v45  ;;  %v3100_v18 = vsel %vm420_vm6, %v2843_v60, 0.0  ;;  %v3103_v28 = vsel %vm408_vm5, %v3067_v51, 0.0  ;;  %v3106_v7 = vsel %vm420_vm6, %v3067_v51, 0.0  ;;  %vm4143_vm12 = vcmp.eq.s32.totalorder %v2192_v44, %v2828_v2 }
 0x141   :  { %4141 = vst [vmem:[#allocation41_spill] sm:$0xff] %v3106_v7  ;;  %vm3112_vm0 = vmpackc.low %vm408_vm5, %vm4143_vm12  ;;  %v4144_v17 = vmov 0  ;;  %v440_v30 = vpack.c.bf16 %v436_v27, %v3038_v14  ;;  %v3119_v60 = vpack.c.bf16 %v3100_v18, %v3043_v38  ;;  %v3123_v24 = vpack.c.bf16 %v3103_v28, %v3053_v52 }
 0x142   :  { %v4145_v17 = vsel %vm3112_vm0, 4294967295, %v4144_v17  ;;  %v3127_v59 = vpack.c.bf16 %v3106_v7, %v3058_v53  ;;  %vm4148_vm12 = vcmp.eq.s32.totalorder %v2192_v44, %v2839_v58  ;;  %v4149_v2 = vmov 0 }
 0x143   :  { %4146 = vst [vmem:[#allocation43_spill] sm:$0xff] %v4145_v17  ;;  %1922 = vmatpush3.bf16.msk.msra.mxu0 %vm2711_vm8, %v4126_v45  ;;  %vm3134_vm5 = vmpackc.low %vm420_vm6, %vm4148_vm12  ;;  %vm409_vm14 = vcmp.eq.s32.totalorder %v2198_v3, %v2831_v47  ;;  %vm421_vm1 = vcmp.eq.s32.totalorder %v2198_v3, %v2849_v8  ;;  %v453_v51 = vsub.f32 %v2947_v57, %v445_v61  ;;  %v4154_v57 = vmov 0 }
 0x144   :  { %4147 = vst [vmem:[#allocation44_spill] sm:$0xff] %v3127_v59  ;;  %v4150_v2 = vsel %vm3134_vm5, 4294967295, %v4149_v2  ;;  %v450_v56 = vsub.f32 %v2870_v25, %v442_v43  ;;  %1923 = vmatprep.subr.msk.bf16.mxu0 %vm2719_vm9, %v4126_v45  ;;  %v437_v48 = vsel %vm409_vm14, %v2845_v5, 0.0  ;;  %v644_v58 = vsel %vm421_vm1, %v2845_v5, 0.0 }
 0x145   :  { %4151 = vst [vmem:[#allocation45_spill] sm:$0xff] %v4150_v2  ;;  %v3148_v44 = vsel %vm409_vm14, %v3108_v6, 0.0  ;;  %v3151_v2 = vsel %vm421_vm1, %v3108_v6, 0.0  ;;  %vm4153_vm6 = vcmp.eq.s32.totalorder %v2194_v9, %v2831_v47  ;;  %v441_v25 = vpack.c.bf16 %v437_v48, %v435_v62 }
 0x146   :  { %4152 = vst [vmem:[#allocation46_spill] sm:$0xff] %v3151_v2  ;;  %vm3155_vm12 = vmpackc.low %vm409_vm14, %vm4153_vm6  ;;  %v648_v43 = vpack.c.bf16 %v644_v58, %v3080_v0  ;;  %v3162_v61 = vpack.c.bf16 %v3148_v44, %v3085_v4  ;;  %v3166_v5 = vpack.c.bf16 %v3151_v2, %v3090_v50  ;;  %vm4157_vm14 = vcmp.eq.s32.totalorder %v2194_v9, %v2849_v8 }
 0x147   :  { %v4155_v57 = vsel %vm3155_vm12, 4294967295, %v4154_v57  ;;  %1471 = vmatprep.mubr.msk.bf16.mxu0 %vm3155_vm12, %v2858_v21  ;;  %vm3173_vm6 = vmpackc.low %vm421_vm1, %vm4157_vm14  ;;  %v4158_v47 = vmov 0  ;;  %v459_v3 = vpack.c.bf16 %v453_v51, %v451_v54  ;;  %v452_v6 = vsub.f32 %v2910_v39, %v444_v13  ;;  %1924 = vmatpush3.bf16.msk.msra.mxu0 %vm2737_vm2, %v4126_v45 }
 0x148   :  { %4156 = vst [vmem:[#allocation47_spill] sm:$0xff] %v4155_v57  ;;  %v4159_v47 = vsel %vm3173_vm6, 4294967295, %v4158_v47  ;;  %1474 = vmatmul.mubr.msk.bf16.gmra.mrb[12].mxu0 %vm3112_vm0, %v2862_v22  ;;  %v650_v55 = vunpack.c.l.bf16 %v2975_v15  ;;  %v652_v7 = vunpack.c.h.bf16 %v2975_v15  ;;  %v447_v53 = vunpack.c.l.bf16 %v441_v25  ;;  %1925 = vmatprep.subr.msk.bf16.mxu0 %vm2743_vm3, %v4126_v45 }
 0x149   :  { %4160 = vst [vmem:[#allocation48_spill] sm:$0xff] %v4159_v47  ;;  %v449_v57 = vunpack.c.h.bf16 %v441_v25  ;;  %v446_v21 = vunpack.c.l.bf16 %v440_v30  ;;  %v448_v2 = vunpack.c.h.bf16 %v440_v30  ;;  %514 = vmatprep.mubr.bf16.mxu1 %v459_v3  ;;  %v458_v8 = vpack.c.bf16 %v452_v6, %v450_v56 }
 0x14a   :  { %v658_v39 = vsub.f32 %v2892_v31, %v650_v55  ;;  %v660_v13 = vsub.f32 %v2952_v12, %v652_v7  ;;  %v463_v9 = vunpack.c.l.bf16 %v459_v3  ;;  %v455_v15 = vsub.f32 %v435_v62, %v447_v53 }
 0x14b   :  { %v457_v17 = vsub.f32 %v437_v48, %v449_v57  ;;  %v454_v25 = vsub.f32 %v3038_v14, %v446_v21  ;;  %v456_v30 = vsub.f32 %v436_v27, %v448_v2  ;;  %v462_v22 = vunpack.c.l.bf16 %v458_v8  ;;  %515 = vmatmul.mubr.bf16.vlgmr.msra.gmra.mrb[0].mxu1 %v458_v8  ;;  %1926 = vmatpush3.bf16.msk.msra.mxu0 %vm2759_vm13, %v4126_v45 }
 0x14c   :  { %v464_v47 = vunpack.c.h.bf16 %v458_v8  ;;  %v666_v59 = vpack.c.bf16 %v660_v13, %v658_v39  ;;  %v465_v50 = vunpack.c.h.bf16 %v459_v3  ;;  %1888 = vmatpush3.bf16.msk.msra.mxu1 %vm4127_vm10, %v4126_v45  ;;  %v471_v12 = vsub.f32 %v451_v54, %v463_v9 }
 0x14d   :  { %v461_v55 = vpack.c.bf16 %v457_v17, %v455_v15  ;;  %v460_v31 = vpack.c.bf16 %v456_v30, %v454_v25  ;;  %v654_v48 = vunpack.c.l.bf16 %v648_v43  ;;  %v3198_v7 = vsub.f32 %v450_v56, %v462_v22  ;;  %1889 = vmatprep.subr.msk.bf16.mxu1 %vm4128_vm7, %v4126_v45 }
 0x14e   :  { %v3200_v21 = vsub.f32 %v452_v6, %v464_v47  ;;  %721 = vmatprep.mubr.bf16.mxu0 %v666_v59  ;;  %v473_v27 = vsub.f32 %v453_v51, %v465_v50  ;;  %v656_v14 = vunpack.c.h.bf16 %v648_v43  ;;  %vm4161_vm1 = vnez %v4099_v40 }
 0x14f   :  { %522 = vmatprep.mubr.bf16.mxu1 %v461_v55  ;;  %1927 = vmatprep.subr.msk.bf16.mxu0 %vm4161_vm1, %v4126_v45  ;;  %v662_v53 = vsub.f32 %v3080_v0, %v654_v48  ;;  %v653_v62 = vunpack.c.l.bf16 %v3119_v60  ;;  %v655_v22 = vunpack.c.h.bf16 %v3119_v60  ;;  %v467_v6 = vunpack.c.l.bf16 %v461_v55 }
 0x150   :  { %v478_v56 = vpack.c.bf16 %v3200_v21, %v3198_v7  ;;  %v479_v54 = vpack.c.bf16 %v473_v27, %v471_v12  ;;  %v664_v2 = vsub.f32 %v644_v58, %v656_v14  ;;  %v469_v57 = vunpack.c.h.bf16 %v461_v55  ;;  %1890 = vmatpush3.bf16.msk.msra.mxu1 %vm4136_vm4, %v4126_v45  ;;  %v4166_v14 = vld [vmem:[#allocation14_spill] sm:$0xff]  ;;  %v4174_v7 = vld [vmem:[#allocation17_spill] sm:$0xff] }
 0x151   :  { %vm4162_vm14 = vnez %v4054_v42  ;;  %v661_v51 = vsub.f32 %v3043_v38, %v653_v62  ;;  %v663_v0 = vsub.f32 %v3100_v18, %v655_v22  ;;  %v3221_v50 = vsub.f32 %v455_v15, %v467_v6  ;;  %1891 = vmatprep.subr.msk.bf16.mxu1 %vm2662_vm11, %v4126_v45  ;;  %v4175_v21 = vld [vmem:[#allocation26_spill] sm:$0xff] }
 0x152   :  { %1928 = vmatpush3.bf16.msk.msra.mxu0 %vm4162_vm14, %v4126_v45  ;;  %v670_v60 = vunpack.c.l.bf16 %v666_v59  ;;  %vm4163_vm0 = vnez %v4101_v46  ;;  %v668_v58 = vpack.c.bf16 %v664_v2, %v662_v53  ;;  %v3229_v43 = vsub.f32 %v457_v17, %v469_v57 }
 0x153   :  { %1929 = vmatprep.subr.msk.bf16.mxu0 %vm4163_vm0, %v4126_v45  ;;  %v672_v47 = vunpack.c.h.bf16 %v666_v59  ;;  %v466_v3 = vunpack.c.l.bf16 %v460_v31  ;;  %v3231_v8 = vpack.c.bf16 %v663_v0, %v661_v51  ;;  %v468_v18 = vunpack.c.h.bf16 %v460_v31  ;;  %523 = vmatmul.mubr.bf16.gmra.mrb[4].mxu1 %v460_v31 }
 0x154   :  { %v3233_v38 = vsub.f32 %v658_v39, %v670_v60  ;;  %v866_v9 = vunpack.c.l.bf16 %v3006_v36  ;;  %v481_v15 = vpack.c.bf16 %v3229_v43, %v3221_v50  ;;  %v674_v48 = vunpack.c.l.bf16 %v668_v58  ;;  %1892 = vmatpush3.bf16.msk.msra.mxu1 %vm2684_vm15, %v4126_v45  ;;  %612 = vmatprep.mubr.bf16.mxu1 %v479_v54  ;;  %v4168_v60 = vld [vmem:[#allocation27_spill] sm:$0xff]  ;;  %v4178_v50 = vld [vmem:[#allocation30_spill] sm:$0xff] }
 0x155   :  { %v3238_v55 = vsub.f32 %v660_v13, %v672_v47  ;;  %v3240_v12 = vsub.f32 %v454_v25, %v466_v3  ;;  %v3245_v17 = vsub.f32 %v456_v30, %v468_v18  ;;  %v676_v59 = vunpack.c.h.bf16 %v668_v58 }
 0x156   :  { %v673_v39 = vunpack.c.l.bf16 %v3231_v8  ;;  %v675_v31 = vunpack.c.h.bf16 %v3231_v8  ;;  %vm4164_vm12 = vnez %v4087_v29  ;;  %vm4165_vm5 = vnez %v4056_v49 }
 0x157   :  { %1893 = vmatprep.subr.msk.bf16.mxu1 %vm4164_vm12, %v4126_v45  ;;  %1930 = vmatpush3.bf16.msk.msra.mxu0 %vm4165_vm5, %v4126_v45  ;;  %v686_v13 = vpack.c.bf16 %v3238_v55, %v3233_v38  ;;  %v3257_v25 = vsub.f32 %v662_v53, %v674_v48  ;;  %v868_v30 = vunpack.c.h.bf16 %v3006_v36  ;;  %v874_v27 = vsub.f32 %v2897_v32, %v866_v9 }
 0x158   :  { %vm4167_vm6 = vnez %v4166_v14  ;;  %v480_v62 = vpack.c.bf16 %v3245_v17, %v3240_v12  ;;  %v3266_v22 = vsub.f32 %v664_v2, %v676_v59  ;;  %v3268_v6 = vsub.f32 %v661_v51, %v673_v39  ;;  %1894 = vmatpush3.bf16.msk.msra.mxu1 %vm2711_vm8, %v4126_v45  ;;  %v4170_v59 = vld [vmem:[#allocation44_spill] sm:$0xff] }
 0x159   :  { %1971 = vmatprep.subr.msk.bf16.mxu0 %vm4167_vm6, %v4126_v45  ;;  %v3270_v54 = vsub.f32 %v663_v0, %v675_v31  ;;  %v876_v53 = vsub.f32 %v2985_v16, %v868_v30  ;;  %v870_v57 = vunpack.c.l.bf16 %v3162_v61  ;;  %v872_v36 = vunpack.c.h.bf16 %v3162_v61  ;;  %1895 = vmatprep.subr.msk.bf16.mxu1 %vm2719_vm9, %v4126_v45  ;;  %v4181_v12 = vld [vmem:[#allocation24_spill] sm:$0xff] }
 0x15a   :  { %v1074_v32 = vunpack.c.l.bf16 %v3010_v10  ;;  %722 = vmatmul.mubr.bf16.vlgmr.msra.gmra.mrb[16].mxu0 %v4168_v60  ;;  %v688_v2 = vpack.c.bf16 %v3266_v22, %v3257_v25  ;;  %v1076_v16 = vunpack.c.h.bf16 %v3010_v10  ;;  %v869_v0 = vunpack.c.l.bf16 %v3123_v24  ;;  %v4183_v25 = vld [vmem:[#allocation25_spill] sm:$0xff]  ;;  %v4186_v22 = vld [vmem:[#allocation23_spill] sm:$0xff] }
 0x15b   :  { %v687_v51 = vpack.c.bf16 %v3270_v54, %v3268_v6  ;;  %729 = vmatprep.mubr.bf16.mxu0 %v668_v58  ;;  %v3289_v61 = vpack.c.bf16 %v876_v53, %v874_v27  ;;  %v878_v47 = vsub.f32 %v3085_v4, %v870_v57  ;;  %v880_v3 = vsub.f32 %v3148_v44, %v872_v36  ;;  %v4188_v6 = vld [vmem:[#allocation18_spill] sm:$0xff]  ;;  %v4189_v54 = vld [vmem:[#allocation48_spill] sm:$0xff] }
 0x15c   :  { %v871_v38 = vunpack.c.h.bf16 %v3123_v24  ;;  %1972 = vmatpush3.bf16.msk.msra.mxu0 %vm4127_vm10, %v4126_v45  ;;  %v1082_v10 = vsub.f32 %v2902_v35, %v1074_v32  ;;  %v1084_v18 = vsub.f32 %v2990_v41, %v1076_v16  ;;  %v877_v9 = vsub.f32 %v3053_v52, %v869_v0  ;;  %1896 = vmatpush3.bf16.msk.msra.mxu1 %vm2737_vm2, %v4126_v45  ;;  %v4169_v52 = vld [vmem:[#allocation40_spill] sm:$0xff]  ;;  %v4172_v32 = vld [vmem:[#allocation37_spill] sm:$0xff] }
 0x15d   :  { %v1078_v58 = vunpack.c.l.bf16 %v3166_v5  ;;  %1973 = vmatprep.subr.msk.bf16.mxu0 %vm4128_vm7, %v4126_v45  ;;  %v3304_v4 = vpack.c.bf16 %v880_v3, %v878_v47  ;;  %v886_v44 = vunpack.c.l.bf16 %v3289_v61  ;;  %v888_v55 = vunpack.c.h.bf16 %v3289_v61  ;;  %1897 = vmatprep.subr.msk.bf16.mxu1 %vm2743_vm3, %v4126_v45 }
 0x15e   :  { %v879_v24 = vsub.f32 %v3103_v28, %v871_v38  ;;  %v3312_v35 = vpack.c.bf16 %v1084_v18, %v1082_v10  ;;  %v1080_v41 = vunpack.c.h.bf16 %v3166_v5  ;;  %v1077_v39 = vunpack.c.l.bf16 %v4170_v59  ;;  %v4171_v5 = vld [vmem:[#allocation46_spill] sm:$0xff] }
 0x15f   :  { %v1086_v48 = vsub.f32 %v4169_v52, %v1078_v58  ;;  %v3322_v31 = vsub.f32 %v874_v27, %v886_v44  ;;  %v3324_v30 = vsub.f32 %v876_v53, %v888_v55  ;;  %v1079_v57 = vunpack.c.h.bf16 %v4170_v59  ;;  %v4173_v53 = vld [vmem:[#allocation41_spill] sm:$0xff] }
 0x160   :  { %v3320_v28 = vpack.c.bf16 %v879_v24, %v877_v9  ;;  %1974 = vmatpush3.bf16.msk.msra.mxu0 %vm4136_vm4, %v4126_v45  ;;  %v1088_v36 = vsub.f32 %v4171_v5, %v1080_v41  ;;  %v1085_v60 = vsub.f32 %v4172_v32, %v1077_v39  ;;  %v890_v16 = vunpack.c.l.bf16 %v3304_v4  ;;  %1898 = vmatpush3.bf16.msk.msra.mxu1 %vm2759_vm13, %v4126_v45 }
 0x161   :  { %v892_v0 = vunpack.c.h.bf16 %v3304_v4  ;;  %1975 = vmatprep.subr.msk.bf16.mxu0 %vm2662_vm11, %v4126_v45  ;;  %v902_v27 = vpack.c.bf16 %v3324_v30, %v3322_v31  ;;  %v1087_v38 = vsub.f32 %v4173_v53, %v1079_v57  ;;  %v1094_v58 = vunpack.c.l.bf16 %v3312_v35  ;;  %1899 = vmatprep.subr.msk.bf16.mxu1 %vm4161_vm1, %v4126_v45  ;;  %v4213_v31 = vld [vmem:[#allocation32_spill] sm:$0xff] }
 0x162   :  { %v1096_v44 = vunpack.c.h.bf16 %v3312_v35  ;;  %730 = vmatmul.mubr.bf16.gmra.mrb[20].mxu0 %v3231_v8  ;;  %v3346_v55 = vpack.c.bf16 %v1088_v36, %v1086_v48  ;;  %v3348_v41 = vsub.f32 %v878_v47, %v890_v16  ;;  %v889_v59 = vunpack.c.l.bf16 %v3320_v28 }
 0x163   :  { %v3350_v52 = vsub.f32 %v880_v3, %v892_v0  ;;  %819 = vmatprep.mubr.bf16.mxu0 %v686_v13  ;;  %v3356_v39 = vpack.c.bf16 %v1087_v38, %v1085_v60  ;;  %v3358_v57 = vsub.f32 %v1082_v10, %v1094_v58  ;;  %v891_v8 = vunpack.c.h.bf16 %v3320_v28 }
 0x164   :  { %v3360_v5 = vsub.f32 %v1084_v18, %v1096_v44  ;;  %1976 = vmatpush3.bf16.msk.msra.mxu0 %vm2684_vm15, %v4126_v45  ;;  %v3368_v3 = vsub.f32 %v877_v9, %v889_v59  ;;  %v1098_v32 = vunpack.c.l.bf16 %v3346_v55  ;;  %v1100_v13 = vunpack.c.h.bf16 %v3346_v55  ;;  %1900 = vmatpush3.bf16.msk.msra.mxu1 %vm4162_vm14, %v4126_v45 }
 0x165   :  { %v904_v47 = vpack.c.bf16 %v3350_v52, %v3348_v41  ;;  %1977 = vmatprep.subr.msk.bf16.mxu0 %vm4164_vm12, %v4126_v45  ;;  %v1097_v10 = vunpack.c.l.bf16 %v3356_v39  ;;  %v1099_v18 = vunpack.c.h.bf16 %v3356_v39  ;;  %v3379_v0 = vsub.f32 %v879_v24, %v891_v8  ;;  %1901 = vmatprep.subr.msk.bf16.mxu1 %vm4163_vm0, %v4126_v45  ;;  %v4197_v8 = vld [vmem:[#allocation38_spill] sm:$0xff] }
 0x166   :  { %v1110_v16 = vpack.c.bf16 %v3360_v5, %v3358_v57  ;;  %v3384_v9 = vsub.f32 %v1086_v48, %v1098_v32  ;;  %v3386_v53 = vsub.f32 %v1088_v36, %v1100_v13  ;;  %v4198_v32 = vld [vmem:[#allocation42_spill] sm:$0xff] }
 0x167   :  { %v3391_v58 = vsub.f32 %v1085_v60, %v1097_v10  ;;  %v3393_v44 = vsub.f32 %v1087_v38, %v1099_v18  ;;  %v903_v24 = vpack.c.bf16 %v3379_v0, %v3368_v3  ;;  %v4195_v60 = vld [vmem:[#allocation15_spill] sm:$0xff]  ;;  %v4196_v38 = vld [vmem:[#allocation21_spill] sm:$0xff]  ;;  %v3592_v13 = vpack.c.bf16 %v4198_v32, %v4197_v8  ;;  %v4204_v18 = vld [vmem:[#allocation34_spill] sm:$0xff] }
 0x168   :  { %1978 = vmatpush3.bf16.msk.msra.mxu0 %vm2711_vm8, %v4126_v45  ;;  %v1112_v48 = vpack.c.bf16 %v3386_v53, %v3384_v9  ;;  %1902 = vmatpush3.bf16.msk.msra.mxu1 %vm4165_vm5, %v4126_v45  ;;  %v3582_v59 = vpack.c.bf16 %v4196_v38, %v4195_v60  ;;  %v4202_v10 = vld [vmem:[#allocation47_spill] sm:$0xff] }
 0x169   :  { %1979 = vmatprep.subr.msk.bf16.mxu0 %vm2719_vm9, %v4126_v45  ;;  %v1111_v36 = vpack.c.bf16 %v3393_v44, %v3391_v58  ;;  %1943 = vmatprep.subr.msk.bf16.mxu1 %vm4167_vm6, %v4126_v45 }
 0x16b   :  { %613 = vmatmul.mubr.bf16.vlgmr.msra.gmra.mrb[8].mxu1 %v478_v56  ;;  %v4177_v56 = vld [vmem:[#allocation31_spill] sm:$0xff] }
 0x16c   :  { %1980 = vmatpush3.bf16.msk.msra.mxu0 %vm2737_vm2, %v4126_v45  ;;  %620 = vmatprep.mubr.bf16.mxu1 %v481_v15  ;;  %v4179_v43 = vpack.c.bf16 %v4177_v56, %v4178_v50  ;;  %v4180_v15 = vld [vmem:[#allocation20_spill] sm:$0xff]  ;;  %v4206_v50 = vld [vmem:[#allocation43_spill] sm:$0xff] }
 0x16d   :  { %1981 = vmatprep.subr.msk.bf16.mxu0 %vm2743_vm3, %v4126_v45  ;;  %1944 = vmatpush3.bf16.msk.msra.mxu1 %vm4127_vm10, %v4126_v45  ;;  %v3496_v17 = vpack.c.bf16 %v4181_v12, %v4180_v15 }
 0x16e   :  { %1945 = vmatprep.subr.msk.bf16.mxu1 %vm4128_vm7, %v4126_v45 }
 0x170   :  { %1982 = vmatpush3.bf16.msk.msra.mxu0 %vm2759_vm13, %v4126_v45 }
 0x171   :  { %1983 = vmatprep.subr.msk.bf16.mxu0 %vm4161_vm1, %v4126_v45  ;;  %1946 = vmatpush3.bf16.msk.msra.mxu1 %vm4136_vm4, %v4126_v45  ;;  %vm4176_vm1 = vnez %v4175_v21 }
 0x172   :  { %1947 = vmatprep.subr.msk.bf16.mxu1 %vm2662_vm11, %v4126_v45 }
 0x173   :  { %621 = vmatmul.mubr.bf16.gmra.mrb[12].mxu1 %v480_v62  ;;  %v4185_v62 = vld [vmem:[#allocation16_spill] sm:$0xff] }
 0x174   :  { %1984 = vmatpush3.bf16.msk.msra.mxu0 %vm4162_vm14, %v4126_v45  ;;  %1573 = vmatprep.mubr.msk.bf16.mxu1 %vm4176_vm1, %v4174_v7  ;;  %vm4182_vm1 = vnez %v4099_v40  ;;  %v4205_v7 = vld [vmem:[#allocation39_spill] sm:$0xff] }
 0x175   :  { %1985 = vmatprep.subr.msk.bf16.mxu0 %vm4163_vm0, %v4126_v45  ;;  %1948 = vmatpush3.bf16.msk.msra.mxu1 %vm2684_vm15, %v4126_v45  ;;  %v3623_v56 = vpack.c.bf16 %v4205_v7, %v4204_v18 }
 0x176   :  { %1949 = vmatprep.subr.msk.bf16.mxu1 %vm4164_vm12, %v4126_v45 }
 0x178   :  { %1986 = vmatpush3.bf16.msk.msra.mxu0 %vm4165_vm5, %v4126_v45 }
 0x179   :  { %2027 = vmatprep.subr.msk.bf16.mxu0 %vm4167_vm6, %v4126_v45  ;;  %1950 = vmatpush3.bf16.msk.msra.mxu1 %vm2711_vm8, %v4126_v45 }
 0x17a   :  { %1951 = vmatprep.subr.msk.bf16.mxu1 %vm2719_vm9, %v4126_v45 }
 0x17b   :  { %820 = vmatmul.mubr.bf16.vlgmr.msra.gmra.mrb[24].mxu0 %v4179_v43 }
 0x17c   :  { %827 = vmatprep.mubr.bf16.mxu0 %v688_v2  ;;  %2028 = vmatpush3.bf16.msk.msra.mxu0 %vm4127_vm10, %v4126_v45  ;;  %v4192_v2 = vld [vmem:[#allocation19_spill] sm:$0xff] }
 0x17d   :  { %2029 = vmatprep.subr.msk.bf16.mxu0 %vm4128_vm7, %v4126_v45  ;;  %1952 = vmatpush3.bf16.msk.msra.mxu1 %vm2737_vm2, %v4126_v45 }
 0x17e   :  { %1953 = vmatprep.subr.msk.bf16.mxu1 %vm2743_vm3, %v4126_v45 }
 0x180   :  { %2030 = vmatpush3.bf16.msk.msra.mxu0 %vm4136_vm4, %v4126_v45  ;;  %vm4184_vm4 = vnez %v4183_v25 }
 0x181   :  { %2031 = vmatprep.subr.msk.bf16.mxu0 %vm2662_vm11, %v4126_v45  ;;  %1954 = vmatpush3.bf16.msk.msra.mxu1 %vm2759_vm13, %v4126_v45 }
 0x182   :  { %1955 = vmatprep.subr.msk.bf16.mxu1 %vm4182_vm1, %v4126_v45 }
 0x183   :  { %828 = vmatmul.mubr.bf16.gmra.mrb[28].mxu0 %v687_v51  ;;  %v4193_v51 = vld [vmem:[#allocation45_spill] sm:$0xff] }
 0x184   :  { %2032 = vmatpush3.bf16.msk.msra.mxu0 %vm2684_vm15, %v4126_v45  ;;  %1681 = vmatprep.mubr.msk.bf16.mxu0 %vm4184_vm4, %v3496_v17  ;;  %vm4187_vm4 = vnez %v4186_v22 }
 0x185   :  { %2033 = vmatprep.subr.msk.bf16.mxu0 %vm4164_vm12, %v4126_v45  ;;  %1956 = vmatpush3.bf16.msk.msra.mxu1 %vm4162_vm14, %v4126_v45 }
 0x186   :  { %1957 = vmatprep.subr.msk.bf16.mxu1 %vm4163_vm0, %v4126_v45 }
 0x188   :  { %2034 = vmatpush3.bf16.msk.msra.mxu0 %vm2711_vm8, %v4126_v45 }
 0x189   :  { %2035 = vmatprep.subr.msk.bf16.mxu0 %vm2719_vm9, %v4126_v45  ;;  %1958 = vmatpush3.bf16.msk.msra.mxu1 %vm4165_vm5, %v4126_v45  ;;  %vm4190_vm9 = vnez %v4189_v54 }
 0x18a   :  { %1999 = vmatprep.subr.msk.bf16.mxu1 %vm4167_vm6, %v4126_v45 }
 0x18c   :  { %2036 = vmatpush3.bf16.msk.msra.mxu0 %vm2737_vm2, %v4126_v45  ;;  %1576 = vmatmul.mubr.msk.bf16.vlgmr.msra.gmra.mrb[16].mxu1 %vm4187_vm4, %v4185_v62  ;;  %vm4191_vm4 = vnez %v4077_v11 }
 0x18d   :  { %2037 = vmatprep.subr.msk.bf16.mxu0 %vm2743_vm3, %v4126_v45  ;;  %1579 = vmatprep.mubr.msk.bf16.mxu1 %vm4190_vm9, %v4188_v6  ;;  %vm4194_vm9 = vnez %v4193_v51 }
 0x18e   :  { %2000 = vmatpush3.bf16.msk.msra.mxu1 %vm4127_vm10, %v4126_v45 }
 0x18f   :  { %2001 = vmatprep.subr.msk.bf16.mxu1 %vm4128_vm7, %v4126_v45 }
 0x190   :  { %2038 = vmatpush3.bf16.msk.msra.mxu0 %vm2759_vm13, %v4126_v45 }
 0x191   :  { %2039 = vmatprep.subr.msk.bf16.mxu0 %vm4182_vm1, %v4126_v45 }
 0x192   :  { %2002 = vmatpush3.bf16.msk.msra.mxu1 %vm4191_vm4, %v4126_v45 }
 0x193   :  { %2003 = vmatprep.subr.msk.bf16.mxu1 %vm2662_vm11, %v4126_v45 }
 0x194   :  { %2040 = vmatpush3.bf16.msk.msra.mxu0 %vm4162_vm14, %v4126_v45  ;;  %1582 = vmatmul.mubr.msk.bf16.gmra.mrb[20].mxu1 %vm4194_vm9, %v4192_v2  ;;  %vm4199_vm9 = vnez %v4091_v33 }
 0x195   :  { %2041 = vmatprep.subr.msk.bf16.mxu0 %vm4163_vm0, %v4126_v45  ;;  %937 = vmatprep.mubr.bf16.mxu1 %v3289_v61  ;;  %v4200_v61 = vld [vmem:[#allocation22_spill] sm:$0xff] }
 0x196   :  { %2004 = vmatpush3.bf16.msk.msra.mxu1 %vm2684_vm15, %v4126_v45  ;;  %vm4201_vm0 = vnez %v4200_v61 }
 0x197   :  { %2005 = vmatprep.subr.msk.bf16.mxu1 %vm4164_vm12, %v4126_v45 }
 0x198   :  { %2042 = vmatpush3.bf16.msk.msra.mxu0 %vm4165_vm5, %v4126_v45  ;;  %vm4203_vm5 = vnez %v4202_v10 }
 0x199   :  { %2083 = vmatprep.subr.msk.bf16.mxu0 %vm4167_vm6, %v4126_v45 }
 0x19a   :  { %2006 = vmatpush3.bf16.msk.msra.mxu1 %vm2711_vm8, %v4126_v45 }
 0x19b   :  { %2007 = vmatprep.subr.msk.bf16.mxu1 %vm4199_vm9, %v4126_v45  ;;  %1684 = vmatmul.mubr.msk.bf16.vlgmr.msra.gmra.mrb[32].mxu0 %vm4201_vm0, %v3582_v59  ;;  %vm4207_vm0 = vnez %v4206_v50 }
 0x19c   :  { %1687 = vmatprep.mubr.msk.bf16.mxu0 %vm4203_vm5, %v3592_v13  ;;  %2084 = vmatpush3.bf16.msk.msra.mxu0 %vm4127_vm10, %v4126_v45  ;;  %vm4208_vm5 = vnez %v4101_v46 }
 0x19d   :  { %2085 = vmatprep.subr.msk.bf16.mxu0 %vm4128_vm7, %v4126_v45 }
 0x19e   :  { %2008 = vmatpush3.bf16.msk.msra.mxu1 %vm2737_vm2, %v4126_v45 }
 0x19f   :  { %2009 = vmatprep.subr.msk.bf16.mxu1 %vm2743_vm3, %v4126_v45 }
 0x1a0   :  { %2086 = vmatpush3.bf16.msk.msra.mxu0 %vm4191_vm4, %v4126_v45 }
 0x1a1   :  { %2087 = vmatprep.subr.msk.bf16.mxu0 %vm2662_vm11, %v4126_v45 }
 0x1a2   :  { %2010 = vmatpush3.bf16.msk.msra.mxu1 %vm2759_vm13, %v4126_v45 }
 0x1a3   :  { %2011 = vmatprep.subr.msk.bf16.mxu1 %vm4182_vm1, %v4126_v45  ;;  %1690 = vmatmul.mubr.msk.bf16.gmra.mrb[36].mxu0 %vm4207_vm0, %v3623_v56  ;;  %vm4209_vm0 = vnez %v4056_v49 }
 0x1a4   :  { %2088 = vmatpush3.bf16.msk.msra.mxu0 %vm2684_vm15, %v4126_v45  ;;  %1145 = vmatprep.mubr.bf16.mxu0 %v3312_v35  ;;  %v4210_v35 = vld [vmem:[#allocation28_spill] sm:$0xff] }
 0x1a5   :  { %2089 = vmatprep.subr.msk.bf16.mxu0 %vm4164_vm12, %v4126_v45 }
 0x1a6   :  { %2012 = vmatpush3.bf16.msk.msra.mxu1 %vm4162_vm14, %v4126_v45 }
 0x1a7   :  { %2013 = vmatprep.subr.msk.bf16.mxu1 %vm4208_vm5, %v4126_v45 }
 0x1a8   :  { %2090 = vmatpush3.bf16.msk.msra.mxu0 %vm2711_vm8, %v4126_v45 }
 0x1a9   :  { %2091 = vmatprep.subr.msk.bf16.mxu0 %vm4199_vm9, %v4126_v45 }
 0x1aa   :  { %2014 = vmatpush3.bf16.msk.msra.mxu1 %vm4209_vm0, %v4126_v45 }
 0x1ab   :  { %2055 = vmatprep.subr.msk.bf16.mxu1 %vm4167_vm6, %v4126_v45 }
 0x1ac   :  { %2092 = vmatpush3.bf16.msk.msra.mxu0 %vm2737_vm2, %v4126_v45 }
 0x1ad   :  { %938 = vmatmul.mubr.bf16.vlgmr.msra.gmra.mrb[24].mxu1 %v4210_v35  ;;  %2093 = vmatprep.subr.msk.bf16.mxu0 %vm2743_vm3, %v4126_v45 }
 0x1ae   :  { %945 = vmatprep.mubr.bf16.mxu1 %v3304_v4  ;;  %2056 = vmatpush3.bf16.msk.msra.mxu1 %vm4127_vm10, %v4126_v45  ;;  %v4211_v4 = vld [vmem:[#allocation29_spill] sm:$0xff] }
 0x1af   :  { %2057 = vmatprep.subr.msk.bf16.mxu1 %vm4128_vm7, %v4126_v45 }
 0x1b0   :  { %2094 = vmatpush3.bf16.msk.msra.mxu0 %vm2759_vm13, %v4126_v45 }
 0x1b1   :  { %2095 = vmatprep.subr.msk.bf16.mxu0 %vm4182_vm1, %v4126_v45 }
 0x1b2   :  { %2058 = vmatpush3.bf16.msk.msra.mxu1 %vm4191_vm4, %v4126_v45 }
 0x1b3   :  { %2059 = vmatprep.subr.msk.bf16.mxu1 %vm2662_vm11, %v4126_v45 }
 0x1b4   :  { %2096 = vmatpush3.bf16.msk.msra.mxu0 %vm4162_vm14, %v4126_v45 }
 0x1b5   :  { %946 = vmatmul.mubr.bf16.gmra.mrb[28].mxu1 %v3320_v28  ;;  %2097 = vmatprep.subr.msk.bf16.mxu0 %vm4208_vm5, %v4126_v45  ;;  %v4212_v28 = vld [vmem:[#allocation33_spill] sm:$0xff] }
 0x1b6   :  { %2060 = vmatpush3.bf16.msk.msra.mxu1 %vm2684_vm15, %v4126_v45  ;;  %1035 = vmatprep.mubr.bf16.mxu1 %v902_v27  ;;  %v4214_v30 = vpack.c.bf16 %v4212_v28, %v4213_v31  ;;  %v4216_v27 = vld [vmem:[#allocation36_spill] sm:$0xff] }
 0x1b7   :  { %2061 = vmatprep.subr.msk.bf16.mxu1 %vm4164_vm12, %v4126_v45 }
 0x1b8   :  { %2098 = vmatpush3.bf16.msk.msra.mxu0 %vm4209_vm0, %v4126_v45 }
 0x1b9   :  { %2139 = vmatprep.subr.msk.bf16.mxu0 %vm4167_vm6, %v4126_v45 }
 0x1ba   :  { %2062 = vmatpush3.bf16.msk.msra.mxu1 %vm2711_vm8, %v4126_v45 }
 0x1bb   :  { %2063 = vmatprep.subr.msk.bf16.mxu1 %vm4199_vm9, %v4126_v45  ;;  %1146 = vmatmul.mubr.bf16.vlgmr.msra.gmra.mrb[40].mxu0 %v4211_v4 }
 0x1bc   :  { %1153 = vmatprep.mubr.bf16.mxu0 %v3346_v55  ;;  %2140 = vmatpush3.bf16.msk.msra.mxu0 %vm4127_vm10, %v4126_v45  ;;  %v4217_v55 = vld [vmem:[#allocation35_spill] sm:$0xff] }
 0x1bd   :  { %2141 = vmatprep.subr.msk.bf16.mxu0 %vm4128_vm7, %v4126_v45  ;;  %v4218_v41 = vpack.c.bf16 %v4216_v27, %v4217_v55 }
 0x1be   :  { %2064 = vmatpush3.bf16.msk.msra.mxu1 %vm2737_vm2, %v4126_v45 }
 0x1bf   :  { %2065 = vmatprep.subr.msk.bf16.mxu1 %vm2743_vm3, %v4126_v45 }
 0x1c0   :  { %2142 = vmatpush3.bf16.msk.msra.mxu0 %vm4191_vm4, %v4126_v45 }
 0x1c1   :  { %2143 = vmatprep.subr.msk.bf16.mxu0 %vm2662_vm11, %v4126_v45 }
 0x1c2   :  { %2066 = vmatpush3.bf16.msk.msra.mxu1 %vm2759_vm13, %v4126_v45 }
 0x1c3   :  { %2067 = vmatprep.subr.msk.bf16.mxu1 %vm4182_vm1, %v4126_v45  ;;  %1154 = vmatmul.mubr.bf16.gmra.mrb[44].mxu0 %v3356_v39 }
 0x1c4   :  { %2144 = vmatpush3.bf16.msk.msra.mxu0 %vm2684_vm15, %v4126_v45  ;;  %1243 = vmatprep.mubr.bf16.mxu0 %v1110_v16 }
 0x1c5   :  { %2145 = vmatprep.subr.msk.bf16.mxu0 %vm4164_vm12, %v4126_v45 }
 0x1c6   :  { %2068 = vmatpush3.bf16.msk.msra.mxu1 %vm4162_vm14, %v4126_v45 }
 0x1c7   :  { %2069 = vmatprep.subr.msk.bf16.mxu1 %vm4208_vm5, %v4126_v45 }
 0x1c8   :  { %2146 = vmatpush3.bf16.msk.msra.mxu0 %vm2711_vm8, %v4126_v45 }
 0x1c9   :  { %2147 = vmatprep.subr.msk.bf16.mxu0 %vm4199_vm9, %v4126_v45 }
 0x1ca   :  { %2070 = vmatpush3.bf16.msk.msra.mxu1 %vm4209_vm0, %v4126_v45 }
 0x1cb   :  { %2111 = vmatprep.subr.msk.bf16.mxu1 %vm4167_vm6, %v4126_v45 }
 0x1cc   :  { %2148 = vmatpush3.bf16.msk.msra.mxu0 %vm2737_vm2, %v4126_v45 }
 0x1cd   :  { %1036 = vmatmul.mubr.bf16.vlgmr.msra.gmra.mrb[32].mxu1 %v4214_v30  ;;  %2149 = vmatprep.subr.msk.bf16.mxu0 %vm2743_vm3, %v4126_v45 }
 0x1ce   :  { %1043 = vmatprep.mubr.bf16.mxu1 %v904_v47  ;;  %2112 = vmatpush3.bf16.msk.msra.mxu1 %vm4127_vm10, %v4126_v45 }
 0x1cf   :  { %2113 = vmatprep.subr.msk.bf16.mxu1 %vm4128_vm7, %v4126_v45 }
 0x1d0   :  { %2150 = vmatpush3.bf16.msk.msra.mxu0 %vm2759_vm13, %v4126_v45 }
 0x1d1   :  { %2151 = vmatprep.subr.msk.bf16.mxu0 %vm4182_vm1, %v4126_v45 }
 0x1d2   :  { %2114 = vmatpush3.bf16.msk.msra.mxu1 %vm4191_vm4, %v4126_v45  ;;  %vm4215_vm4 = vnez %v4175_v21 }
 0x1d3   :  { %2115 = vmatprep.subr.msk.bf16.mxu1 %vm2662_vm11, %v4126_v45 }
 0x1d4   :  { %2152 = vmatpush3.bf16.msk.msra.mxu0 %vm4162_vm14, %v4126_v45 }
 0x1d5   :  { %1044 = vmatmul.mubr.bf16.gmra.mrb[36].mxu1 %v903_v24  ;;  %2153 = vmatprep.subr.msk.bf16.mxu0 %vm4208_vm5, %v4126_v45 }
 0x1d6   :  { %2116 = vmatpush3.bf16.msk.msra.mxu1 %vm2684_vm15, %v4126_v45  ;;  %1789 = vmatprep.mubr.msk.bf16.mxu1 %vm4215_vm4, %v3496_v17  ;;  %vm4219_vm4 = vnez %v4186_v22 }
 0x1d7   :  { %2117 = vmatprep.subr.msk.bf16.mxu1 %vm4164_vm12, %v4126_v45 }
 0x1d8   :  { %2154 = vmatpush3.bf16.msk.msra.mxu0 %vm4209_vm0, %v4126_v45 }
 0x1da   :  { %2118 = vmatpush3.bf16.msk.msra.mxu1 %vm2711_vm8, %v4126_v45 }
 0x1db   :  { %2119 = vmatprep.subr.msk.bf16.mxu1 %vm4199_vm9, %v4126_v45  ;;  %1244 = vmatmul.mubr.bf16.vlgmr.msra.gmra.mrb[48].mxu0 %v4218_v41 }
 0x1de   :  { %2120 = vmatpush3.bf16.msk.msra.mxu1 %vm2737_vm2, %v4126_v45 }
 0x1df   :  { %2121 = vmatprep.subr.msk.bf16.mxu1 %vm2743_vm3, %v4126_v45 }
 0x1e2   :  { %2122 = vmatpush3.bf16.msk.msra.mxu1 %vm2759_vm13, %v4126_v45 }
 0x1e3   :  { %2123 = vmatprep.subr.msk.bf16.mxu1 %vm4182_vm1, %v4126_v45  ;;  %vm4220_vm1 = vnez %v4189_v54 }
 0x1e6   :  { %2124 = vmatpush3.bf16.msk.msra.mxu1 %vm4162_vm14, %v4126_v45 }
 0x1e7   :  { %2125 = vmatprep.subr.msk.bf16.mxu1 %vm4208_vm5, %v4126_v45 }
 0x1ea   :  { %2126 = vmatpush3.bf16.msk.msra.mxu1 %vm4209_vm0, %v4126_v45  ;;  %vm4221_vm0 = vnez %v4077_v11 }
 0x1eb   :  { %2167 = vmatprep.subr.msk.bf16.mxu1 %vm4167_vm6, %v4126_v45  ;;  %vm4222_vm6 = vnez %v4193_v51 }
 0x1ed   :  { %1792 = vmatmul.mubr.msk.bf16.vlgmr.msra.gmra.mrb[40].mxu1 %vm4219_vm4, %v3582_v59 }
 0x1ee   :  { %1795 = vmatprep.mubr.msk.bf16.mxu1 %vm4220_vm1, %v3592_v13  ;;  %2175 = vmatpush3.bf16.msk.msra.mxu1 %vm4127_vm10, %v4126_v45 }
 0x1ef   :  { %2168 = vmatprep.subr.msk.bf16.mxu1 %vm4128_vm7, %v4126_v45 }
 0x1f2   :  { %2176 = vmatpush3.bf16.msk.msra.mxu1 %vm4221_vm0, %v4126_v45 }
 0x1f3   :  { %2169 = vmatprep.subr.msk.bf16.mxu1 %vm2662_vm11, %v4126_v45  ;;  %vm4223_vm11 = vnez %v4099_v40 }
 0x1f5   :  { %1798 = vmatmul.mubr.msk.bf16.gmra.mrb[44].mxu1 %vm4222_vm6, %v3623_v56 }
 0x1f6   :  { %2177 = vmatpush3.bf16.msk.msra.mxu1 %vm2684_vm15, %v4126_v45  ;;  %1251 = vmatprep.mubr.bf16.mxu1 %v1112_v48 }
 0x1f7   :  { %2170 = vmatprep.subr.msk.bf16.mxu1 %vm4164_vm12, %v4126_v45 }
 0x1fa   :  { %2178 = vmatpush3.bf16.msk.msra.mxu1 %vm2711_vm8, %v4126_v45 }
 0x1fb   :  { %2171 = vmatprep.subr.msk.bf16.mxu1 %vm4199_vm9, %v4126_v45  ;;  %vm4224_vm9 = vnez %v4056_v49 }
 0x1fe   :  { %2179 = vmatpush3.bf16.msk.msra.mxu1 %vm2737_vm2, %v4126_v45 }
 0x1ff   :  { %2172 = vmatprep.subr.msk.bf16.mxu1 %vm2743_vm3, %v4126_v45 }
 0x202   :  { %2180 = vmatpush3.bf16.msk.msra.mxu1 %vm2759_vm13, %v4126_v45 }
 0x203   :  { %2173 = vmatprep.subr.msk.bf16.mxu1 %vm4223_vm11, %v4126_v45 }
 0x206   :  { %2181 = vmatpush3.bf16.msk.msra.mxu1 %vm4162_vm14, %v4126_v45  ;;  %v1875_v37 = vpop.f32.mrb[8].mxu0 }
 0x207   :  { %2174 = vmatprep.subr.msk.bf16.mxu1 %vm4208_vm5, %v4126_v45  ;;  %v1876_v63 = vpop.f32.mrb[9].mxu0 }
 0x208   :  { %v1877_v11 = vadd.f32 %v1876_v63, %v1875_v37  ;;  %v1878_v23 = vpop.f32.mrb[10].mxu0 }
 0x209   :  { %v1879_v26 = vpop.f32.mrb[11].mxu0 }
 0x20a   :  { %2182 = vmatpush3.bf16.msk.msra.mxu1 %vm4224_vm9, %v4126_v45  ;;  %v1880_v29 = vadd.f32 %v1879_v26, %v1878_v23 }
 0x20d   :  { %1252 = vmatmul.mubr.bf16.vlgmr.msra.gmra.mrb[48].mxu1 %v1111_v36 }
 0x21b   :  { %v1881_v42 = vpop.f32.mrb[12].mxu0 }
 0x21c   :  { %v1882_v1 = vpop.f32.mrb[13].mxu0 }
 0x21d   :  { %v1883_v33 = vadd.f32 %v1882_v1, %v1881_v42  ;;  %v1884_v19 = vpop.f32.mrb[14].mxu0 }
 0x21e   :  { %v1885_v20 = vpop.f32.mrb[15].mxu0  ;;  %v1847_v34 = vpop.f32.mrb[0].mxu1 }
 0x21f   :  { %v1886_v40 = vadd.f32 %v1885_v20, %v1884_v19  ;;  %v1848_v46 = vpop.f32.mrb[1].mxu1 }
 0x220   :  { %v1849_v49 = vadd.f32 %v1848_v46, %v1847_v34  ;;  %v1850_v45 = vpop.f32.mrb[2].mxu1 }
 0x221   :  { %v1851_v14 = vpop.f32.mrb[3].mxu1 }
 0x222   :  { %v566_v52 = vadd.f32 %v1877_v11, %v1849_v49  ;;  %v1852_v39 = vadd.f32 %v1851_v14, %v1850_v45 }
 0x224   :  { %v569_v57 = vadd.f32 %v1880_v29, %v1852_v39 }
 0x226   :  { %v1853_v5 = vpop.f32.mrb[4].mxu1 }
 0x227   :  { %v1854_v47 = vpop.f32.mrb[5].mxu1 }
 0x228   :  { %v1855_v3 = vadd.f32 %v1854_v47, %v1853_v5  ;;  %v1856_v16 = vpop.f32.mrb[6].mxu1 }
 0x229   :  { %v1857_v0 = vpop.f32.mrb[7].mxu1 }
 0x22a   :  { %v574_v9 = vadd.f32 %v1883_v33, %v1855_v3  ;;  %v1858_v53 = vadd.f32 %v1857_v0, %v1856_v16 }
 0x22c   :  { %v577_v44 = vadd.f32 %v1886_v40, %v1858_v53 }
 0x22d   :  { %v1931_v58 = vpop.f32.mrb[16].mxu0 }
 0x22e   :  { %v1932_v24 = vpop.f32.mrb[17].mxu0 }
 0x22f   :  { %v1933_v48 = vadd.f32 %v1932_v24, %v1931_v58  ;;  %v1934_v36 = vpop.f32.mrb[18].mxu0 }
 0x230   :  { %v1935_v21 = vpop.f32.mrb[19].mxu0 }
 0x231   :  { %v1936_v43 = vadd.f32 %v1935_v21, %v1934_v36 }
 0x235   :  { %v1937_v15 = vpop.f32.mrb[20].mxu0 }
 0x236   :  { %v1938_v12 = vpop.f32.mrb[21].mxu0 }
 0x237   :  { %v1939_v17 = vadd.f32 %v1938_v12, %v1937_v15  ;;  %v1940_v25 = vpop.f32.mrb[22].mxu0 }
 0x238   :  { %v1941_v62 = vpop.f32.mrb[23].mxu0 }
 0x239   :  { %v1942_v22 = vadd.f32 %v1941_v62, %v1940_v25 }
 0x23e   :  { %v1903_v6 = vpop.f32.mrb[8].mxu1 }
 0x23f   :  { %v1904_v54 = vpop.f32.mrb[9].mxu1 }
 0x240   :  { %v1905_v2 = vadd.f32 %v1904_v54, %v1903_v6  ;;  %v1906_v51 = vpop.f32.mrb[10].mxu1 }
 0x241   :  { %v1907_v60 = vpop.f32.mrb[11].mxu1 }
 0x242   :  { %v629_v38 = vadd.f32 %v1905_v2, %v566_v52  ;;  %v1908_v59 = vadd.f32 %v1907_v60, %v1906_v51 }
 0x244   :  { %633 = vst [vmem:[#allocation7] sm:$0xff] %v629_v38  ;;  %v630_v8 = vadd.f32 %v1908_v59, %v569_v57 }
 0x246   :  { %634 = vst [vmem:[#allocation7 + $0x8] sm:$0xff] %v630_v8  ;;  %v1909_v32 = vpop.f32.mrb[12].mxu1 }
 0x247   :  { %v1910_v13 = vpop.f32.mrb[13].mxu1 }
 0x248   :  { %v1911_v61 = vadd.f32 %v1910_v13, %v1909_v32  ;;  %v1912_v10 = vpop.f32.mrb[14].mxu1 }
 0x249   :  { %v1913_v18 = vpop.f32.mrb[15].mxu1 }
 0x24a   :  { %v631_v7 = vadd.f32 %v1911_v61, %v574_v9  ;;  %v1914_v56 = vadd.f32 %v1913_v18, %v1912_v10 }
 0x24c   :  { %635 = vst [vmem:[#allocation7 + $0x10] sm:$0xff] %v631_v7  ;;  %v632_v50 = vadd.f32 %v1914_v56, %v577_v44 }
 0x24e   :  { %v1987_v35 = vpop.f32.mrb[24].mxu0  ;;  %636 = vst [vmem:[#allocation7 + $0x18] sm:$0xff] %v632_v50 }
 0x24f   :  { %v1988_v4 = vpop.f32.mrb[25].mxu0 }
 0x250   :  { %v1989_v28 = vadd.f32 %v1988_v4, %v1987_v35  ;;  %v1990_v31 = vpop.f32.mrb[26].mxu0 }
 0x251   :  { %v1991_v30 = vpop.f32.mrb[27].mxu0 }
 0x252   :  { %v1992_v27 = vadd.f32 %v1991_v30, %v1990_v31 }
 0x256   :  { %v1993_v55 = vpop.f32.mrb[28].mxu0 }
 0x257   :  { %v1994_v41 = vpop.f32.mrb[29].mxu0 }
 0x258   :  { %v1995_v37 = vadd.f32 %v1994_v41, %v1993_v55  ;;  %v1996_v63 = vpop.f32.mrb[30].mxu0 }
 0x259   :  { %v1997_v11 = vpop.f32.mrb[31].mxu0 }
 0x25a   :  { %v1998_v23 = vadd.f32 %v1997_v11, %v1996_v63 }
 0x25f   :  { %v1959_v26 = vpop.f32.mrb[16].mxu1 }
 0x260   :  { %v1960_v29 = vpop.f32.mrb[17].mxu1 }
 0x261   :  { %v1961_v42 = vadd.f32 %v1960_v29, %v1959_v26  ;;  %v1962_v1 = vpop.f32.mrb[18].mxu1 }
 0x262   :  { %v1963_v33 = vpop.f32.mrb[19].mxu1 }
 0x263   :  { %v773_v19 = vadd.f32 %v1961_v42, %v1933_v48  ;;  %v1964_v20 = vadd.f32 %v1963_v33, %v1962_v1 }
 0x265   :  { %v836_v34 = vadd.f32 %v1989_v28, %v773_v19  ;;  %v776_v40 = vadd.f32 %v1964_v20, %v1936_v43 }
 0x267   :  { %840 = vst [vmem:[#allocation8] sm:$0xff] %v836_v34  ;;  %v837_v46 = vadd.f32 %v1992_v27, %v776_v40  ;;  %v1965_v49 = vpop.f32.mrb[20].mxu1 }
 0x268   :  { %v1966_v45 = vpop.f32.mrb[21].mxu1 }
 0x269   :  { %841 = vst [vmem:[#allocation8 + $0x8] sm:$0xff] %v837_v46  ;;  %v1967_v14 = vadd.f32 %v1966_v45, %v1965_v49  ;;  %v1968_v52 = vpop.f32.mrb[22].mxu1 }
 0x26a   :  { %v1969_v39 = vpop.f32.mrb[23].mxu1 }
 0x26b   :  { %v781_v57 = vadd.f32 %v1967_v14, %v1939_v17  ;;  %v1970_v5 = vadd.f32 %v1969_v39, %v1968_v52 }
 0x26d   :  { %v838_v47 = vadd.f32 %v1995_v37, %v781_v57  ;;  %v784_v3 = vadd.f32 %v1970_v5, %v1942_v22 }
 0x26e   :  { %v2043_v16 = vpop.f32.mrb[32].mxu0 }
 0x26f   :  { %v2044_v0 = vpop.f32.mrb[33].mxu0  ;;  %842 = vst [vmem:[#allocation8 + $0x10] sm:$0xff] %v838_v47  ;;  %v839_v9 = vadd.f32 %v1998_v23, %v784_v3 }
 0x270   :  { %v2045_v53 = vadd.f32 %v2044_v0, %v2043_v16  ;;  %v2046_v58 = vpop.f32.mrb[34].mxu0 }
 0x271   :  { %v2047_v44 = vpop.f32.mrb[35].mxu0  ;;  %843 = vst [vmem:[#allocation8 + $0x18] sm:$0xff] %v839_v9 }
 0x272   :  { %v2048_v24 = vadd.f32 %v2047_v44, %v2046_v58 }
 0x276   :  { %v2049_v48 = vpop.f32.mrb[36].mxu0 }
 0x277   :  { %v2050_v36 = vpop.f32.mrb[37].mxu0 }
 0x278   :  { %v2051_v21 = vadd.f32 %v2050_v36, %v2049_v48  ;;  %v2052_v43 = vpop.f32.mrb[38].mxu0 }
 0x279   :  { %v2053_v15 = vpop.f32.mrb[39].mxu0 }
 0x27a   :  { %v2054_v12 = vadd.f32 %v2053_v15, %v2052_v43 }
 0x280   :  { %v2015_v25 = vpop.f32.mrb[24].mxu1 }
 0x281   :  { %v2016_v17 = vpop.f32.mrb[25].mxu1 }
 0x282   :  { %v2017_v62 = vadd.f32 %v2016_v17, %v2015_v25  ;;  %v2018_v6 = vpop.f32.mrb[26].mxu1 }
 0x283   :  { %v2019_v22 = vpop.f32.mrb[27].mxu1 }
 0x284   :  { %v989_v54 = vadd.f32 %v2045_v53, %v2017_v62  ;;  %v2020_v2 = vadd.f32 %v2019_v22, %v2018_v6 }
 0x286   :  { %v992_v51 = vadd.f32 %v2048_v24, %v2020_v2 }
 0x288   :  { %v2021_v60 = vpop.f32.mrb[28].mxu1 }
 0x289   :  { %v2022_v38 = vpop.f32.mrb[29].mxu1 }
 0x28a   :  { %v2023_v59 = vadd.f32 %v2022_v38, %v2021_v60  ;;  %v2024_v8 = vpop.f32.mrb[30].mxu1 }
 0x28b   :  { %v2025_v32 = vpop.f32.mrb[31].mxu1 }
 0x28c   :  { %v997_v13 = vadd.f32 %v2051_v21, %v2023_v59  ;;  %v2026_v61 = vadd.f32 %v2025_v32, %v2024_v8 }
 0x28e   :  { %v1000_v10 = vadd.f32 %v2054_v12, %v2026_v61  ;;  %v2099_v18 = vpop.f32.mrb[40].mxu0 }
 0x28f   :  { %v2100_v7 = vpop.f32.mrb[41].mxu0 }
 0x290   :  { %v2101_v56 = vadd.f32 %v2100_v7, %v2099_v18  ;;  %v2102_v50 = vpop.f32.mrb[42].mxu0 }
 0x291   :  { %v2103_v35 = vpop.f32.mrb[43].mxu0 }
 0x292   :  { %v2104_v4 = vadd.f32 %v2103_v35, %v2102_v50 }
 0x296   :  { %v2105_v28 = vpop.f32.mrb[44].mxu0 }
 0x297   :  { %v2106_v31 = vpop.f32.mrb[45].mxu0 }
 0x298   :  { %v3917_v30 = vadd.f32 %v2106_v31, %v2105_v28  ;;  %v2108_v27 = vpop.f32.mrb[46].mxu0 }
 0x299   :  { %v2109_v55 = vpop.f32.mrb[47].mxu0 }
 0x29a   :  { %v3919_v41 = vadd.f32 %v2109_v55, %v2108_v27 }
 0x2a0   :  { %v2071_v37 = vpop.f32.mrb[32].mxu1 }
 0x2a1   :  { %v2072_v63 = vpop.f32.mrb[33].mxu1 }
 0x2a2   :  { %v2073_v11 = vadd.f32 %v2072_v63, %v2071_v37  ;;  %v2074_v23 = vpop.f32.mrb[34].mxu1 }
 0x2a3   :  { %v2075_v26 = vpop.f32.mrb[35].mxu1 }
 0x2a4   :  { %v1052_v29 = vadd.f32 %v2073_v11, %v989_v54  ;;  %v2076_v42 = vadd.f32 %v2075_v26, %v2074_v23 }
 0x2a6   :  { %1057 = vst [vmem:[#allocation7 + $0x20] sm:$0xff] %v1052_v29  ;;  %v1053_v1 = vadd.f32 %v2076_v42, %v992_v51 }
 0x2a8   :  { %1058 = vst [vmem:[#allocation7 + $0x28] sm:$0xff] %v1053_v1  ;;  %v2077_v33 = vpop.f32.mrb[36].mxu1 }
 0x2a9   :  { %v2078_v19 = vpop.f32.mrb[37].mxu1 }
 0x2aa   :  { %v2079_v20 = vadd.f32 %v2078_v19, %v2077_v33  ;;  %v2080_v34 = vpop.f32.mrb[38].mxu1 }
 0x2ab   :  { %v2081_v40 = vpop.f32.mrb[39].mxu1 }
 0x2ac   :  { %v1054_v46 = vadd.f32 %v2079_v20, %v997_v13  ;;  %v2082_v49 = vadd.f32 %v2081_v40, %v2080_v34 }
 0x2ae   :  { %1059 = vst [vmem:[#allocation7 + $0x30] sm:$0xff] %v1054_v46  ;;  %v1055_v45 = vadd.f32 %v2082_v49, %v1000_v10  ;;  %v2155_v14 = vpop.f32.mrb[48].mxu0 }
 0x2af   :  { %v2156_v52 = vpop.f32.mrb[49].mxu0 }
 0x2b0   :  { %1060 = vst [vmem:[#allocation7 + $0x38] sm:$0xff] %v1055_v45  ;;  %v2157_v39 = vadd.f32 %v2156_v52, %v2155_v14  ;;  %v2158_v57 = vpop.f32.mrb[50].mxu0 }
 0x2b1   :  { %v2159_v5 = vpop.f32.mrb[51].mxu0 }
 0x2b2   :  { %2264 = shalt.err (!%p2261_p6)
}
 0x2b3   :  { %s2265_s14 = scalar_lea.hbm %s3955_s2, 1024 }
 0x2b4   :  { %p2266_p7 = scmp.ne.s32.totalorder %s3955_s2, %s2265_s14  ;;  %p2269_p8 = scmp.lt.u32.totalorder %s2265_s14, %s3955_s2 }
 0x2b6   :  { %p2271_p9 = pnand %p2269_p8, %p2266_p7 }
 0x2b8   :  { %2274 = shalt.err (!%p2271_p9)
}
 0x2b9   :  { %s2312_s19 = smov 128   ;;  %s2313_s20 = smov 8   ;;  %v2160_v47 = vadd.f32 %v2159_v5, %v2158_v57 }
 0x2ba   :  { %1280 = dma.vmem_to_hbm [thread:$0]  %s1275_s10, 1024, %s3955_s2, [#allocation4], %s2312_s19, %s2312_s19, %s2313_s20  }
 0x2bb   :  { %s2314_s2 = smov [#allocation8]  }
 0x2bc   :  { %s1286_s23 = sshll.u32 %s2314_s2, 4  ;;  %s1287_s23 = int_to_ptr.vmem [resolvable:$true] %s1286_s23 }
 0x2bd   :  { %s2275_s24 = scalar_lea.vmem %s1287_s23, 1024  ;;  %p2280_p11 = scmp.lt.s32.totalorder %s1287_s23, %s1287_s23 }
 0x2be   :  { %p2276_p10 = scmp.ne.s32.totalorder %s1287_s23, %s2275_s24  ;;  %p2281_p12 = scmp.lt.s32.totalorder %s2275_s24, %s2275_s24 }
 0x2c0   :  { %v2127_v3 = vpop.f32.mrb[40].mxu1  ;;  %p2282_p13 = por %p2281_p12, %p2280_p11 }
 0x2c1   :  { %v2128_v16 = vpop.f32.mrb[41].mxu1 }
 0x2c2   :  { %v2129_v0 = vadd.f32 %v2128_v16, %v2127_v3  ;;  %v2130_v9 = vpop.f32.mrb[42].mxu1  ;;  %p2283_p0 = pnand %p2282_p13, %p2276_p10 }
 0x2c3   :  { %v2131_v53 = vpop.f32.mrb[43].mxu1 }
 0x2c4   :  { %v1197_v58 = vadd.f32 %v2129_v0, %v2101_v56  ;;  %v2132_v44 = vadd.f32 %v2131_v53, %v2130_v9 }
 0x2c6   :  { %v1260_v24 = vadd.f32 %v2157_v39, %v1197_v58  ;;  %v1200_v48 = vadd.f32 %v2132_v44, %v2104_v4 }
 0x2c8   :  { %1265 = vst [vmem:[#allocation8 + $0x20] sm:$0xff] %v1260_v24  ;;  %v1261_v36 = vadd.f32 %v2160_v47, %v1200_v48  ;;  %v2133_v21 = vpop.f32.mrb[44].mxu1 }
 0x2c9   :  { %v2134_v43 = vpop.f32.mrb[45].mxu1 }
 0x2ca   :  { %1266 = vst [vmem:[#allocation8 + $0x28] sm:$0xff] %v1261_v36  ;;  %v2135_v15 = vadd.f32 %v2134_v43, %v2133_v21  ;;  %v2136_v12 = vpop.f32.mrb[46].mxu1 }
 0x2cb   :  { %v2137_v25 = vpop.f32.mrb[47].mxu1 }
 0x2cc   :  { %v1205_v17 = vadd.f32 %v2135_v15, %v3917_v30  ;;  %v2138_v62 = vadd.f32 %v2137_v25, %v2136_v12 }
 0x2ce   :  { %v1208_v6 = vadd.f32 %v2138_v62, %v3919_v41 }
 0x2e0   :  { %v2161_v22 = vpop.f32.mrb[48].mxu1 }
 0x2e1   :  { %v2162_v54 = vpop.f32.mrb[49].mxu1 }
 0x2e2   :  { %v2163_v2 = vadd.f32 %v2162_v54, %v2161_v22  ;;  %v2164_v51 = vpop.f32.mrb[50].mxu1 }
 0x2e3   :  { %v2165_v60 = vpop.f32.mrb[51].mxu1 }
 0x2e4   :  { %v1262_v38 = vadd.f32 %v2163_v2, %v1205_v17  ;;  %v2166_v59 = vadd.f32 %v2165_v60, %v2164_v51 }
 0x2e6   :  { %1267 = vst [vmem:[#allocation8 + $0x30] sm:$0xff] %v1262_v38  ;;  %v1263_v8 = vadd.f32 %v2166_v59, %v1208_v6 }
 0x2e8   :  { %1268 = vst [vmem:[#allocation8 + $0x38] sm:$0xff] %v1263_v8 }
 0x2e9   :  { %2286 = shalt.err (!%p2283_p0)
}
 0x2ea   :  { %s2287_s27 = scalar_lea.hbm %s3956_s3, 1024 }
 0x2eb   :  { %p2288_p1 = scmp.ne.s32.totalorder %s3956_s3, %s2287_s27  ;;  %p2291_p2 = scmp.lt.u32.totalorder %s2287_s27, %s3956_s3 }
 0x2ed   :  { %p2293_p3 = pnand %p2291_p2, %p2288_p1 }
 0x2ef   :  { %2296 = shalt.err (!%p2293_p3)
}
 0x2f0   :  { %1292 = dma.vmem_to_hbm [thread:$0]  %s1287_s23, 1024, %s3956_s3, [#allocation9], %s2312_s19, %s2312_s19, %s2313_s20  }
 0x2f1   :  { %2301 = dma.done.wait [#allocation4], 1024  }
 0x2f2   :  { %2302 = vsyncadd [#allocation4], 4294966272 }
 0x2f3   :  { %2303 = dma.done.wait [#allocation9], 1024  }
 0x2f4   :  { %2304 = vsyncadd [#allocation9], 4294966272 }
 0x2f5   :  { %1299 = vsyncpa [#allocation3], 1 }
 0x2f6   :  { %1300 = vsyncpa [#allocation6], 1 }
 0x2f7   :  { %1301 = vsyncpa [#allocation4], 1 }
 0x2f8   :  { %1302 = vsyncpa [#allocation9], 1 }

</bundles_post_ra>
